<compile_context>
chip_gen: v7x
topology: tpu7x:2x2x1
jax: 0.10.0
libtpu: 0.0.40
codegen_flags: <defaults>
</compile_context>

<pallas_src>
import jax
import jax.numpy as jnp
from jax.experimental import pallas as pl
from jax.experimental.pallas import tpu as pltpu

F_PAD = 128     # conv output channels padded to the full 128-lane width
NC_PAD = 128    # classifier logits padded to the full 128-lane width


def _choose_imgs(B):
    """Images per grid step: amortise per-step overhead, keep grid >= 2 (v7x)."""
    target = 8
    if B >= 2 * target:
        return target
    return max(1, B // 2)


# ----------------------------- Pallas kernel ------------------------------ #
def _make_kernel(H, W, Wp, C, K, F, IMGS, IMGS_PAD):
    """im2col -> one conv matmul -> ReLU -> pool-matmul -> head matmul."""
    HWp = H * Wp                      # flattened conv-output rows per image
    KKC = K * K * C                   # packed contraction width (36)
    inv_hw = 1.0 / float(H * W)       # exact in bf16 for power-of-two H*W

    def kernel(x_ref, wconv_ref, whead_ref, out_ref, col_ref, pooled_ref):
        # x_ref     : [IMGS, n_rows, C]     bf16  flattened halo-padded images
        # wconv_ref : [KKC, F_PAD]          bf16  packed per-tap conv weights
        # whead_ref : [F_PAD, NC_PAD]       bf16  head weights; row F = bias
        # out_ref   : [1, IMGS_PAD, NC_PAD] f32   one logit row per image
        # col_ref   : [HWp, KKC]            bf16  im2col VMEM scratch
        # pooled_ref: [IMGS_PAD, F_PAD]     f32   pooled features per image

        # Pooling mask row: inv_hw on valid flat columns (col % Wp < W),
        # 0 on halo wrap-around junk columns.  Mask + mean scale folded in.
        col_idx = jax.lax.broadcasted_iota(jnp.int32, (1, HWp), 1)
        mask_row = jnp.where(col_idx % Wp < W, inv_hw, 0.0).astype(jnp.bfloat16)

        if IMGS < IMGS_PAD:           # zero the padding rows once per step
            pooled_ref[...] = jnp.zeros_like(pooled_ref)

        for m in range(IMGS):
            # In-VMEM im2col: K*K lane-offset copies of the shifted rows.
            for t in range(K * K):
                di, dj = t // K, t % K
                shift = di * Wp + dj
                col_ref[:, t * C:(t + 1) * C] = x_ref[m, shift:shift + HWp, :]

            # One dense MXU matmul: (HWp, KKC) @ (KKC, F_PAD), f32 accumulate.
            conv = jnp.dot(col_ref[...], wconv_ref[...],
                           preferred_element_type=jnp.float32)
            # ReLU in f32 on the VPU; bf16 only as the MXU pooling operand.
            act = jnp.maximum(conv, 0.0).astype(jnp.bfloat16)
            # Masked mean pool as a matmul on the (otherwise idle) MXU.
            pooled_ref[m:m + 1, :] = jnp.dot(
                mask_row, act, preferred_element_type=jnp.float32)

        pooled = pooled_ref[...]
        # Folded bias: pooled lane F carries 1.0, head row F carries the bias.
        lane = jax.lax.broadcasted_iota(jnp.int32, (IMGS_PAD, F_PAD), 1)
        pooled = jnp.where(lane == F, 1.0, pooled)

        logits = jnp.dot(pooled.astype(jnp.bfloat16), whead_ref[...],
                         preferred_element_type=jnp.float32)   # (IMGS_PAD,NC_PAD)
        out_ref[0] = logits            # full (IMGS_PAD, 128) unmasked store

    return kernel


# ------------------------------- wrapper ----------------------------------- #
def _prepare_params(w_conv, w_head, bias):
    """Packed, lane-padded bf16 operands; bias folded into the head matmul."""
    F, C, K, _ = w_conv.shape
    NC = w_head.shape[0]
    # packed conv weights: row (t*C + c) = w_conv[:, c, di, dj], t = di*K + dj.
    w_packed = jnp.transpose(w_conv, (2, 3, 1, 0)).reshape(K * K * C, F)
    w_packed = jnp.pad(w_packed, ((0, 0), (0, F_PAD - F)))
    # head: rows [:F] = w_head.T, row F = bias (multiplied by pooled lane F=1).
    whead = jnp.zeros((F_PAD, NC_PAD), jnp.float32)
    whead = whead.at[:F, :NC].set(w_head.T)
    whead = whead.at[F, :NC].set(bias)
    return w_packed.astype(jnp.bfloat16), whead.astype(jnp.bfloat16)


def _prepare_x(x, K, n_rows, B_pad):
    """NCHW -> halo-padded NHWC, flattened to [B_pad, n_rows, C] bf16 rows."""
    B, C, H, W = x.shape
    p = K // 2
    xh = jnp.transpose(x, (0, 2, 3, 1))                       # NHWC
    xp = jnp.pad(xh, ((0, 0), (p, p), (p, p), (0, 0)))        # spatial halo
    Hp, Wp = H + 2 * p, W + 2 * p
    xf = xp.reshape(B, Hp * Wp, C)
    xf = jnp.pad(xf, ((0, B_pad - B), (0, n_rows - Hp * Wp), (0, 0)))
    return xf.astype(jnp.bfloat16)


@jax.jit
def model_base_forward(x, w_conv, w_head, bias):
    """Equivalent of ModelBase.forward(x) with the synthetic built network.

    x      : [B, C, H, W]  (NCHW, float32)
    w_conv : [F, C, K, K]  (PyTorch Conv2d weight layout)
    w_head : [NC, F]       (PyTorch Linear weight layout)
    bias   : [NC]
    returns: [B, NC] float32 logits
    """
    B, C, H, W = x.shape
    F, _, K, _ = w_conv.shape
    NC = w_head.shape[0]
    assert F < F_PAD and NC <= NC_PAD

    p = K // 2
    Wp = W + 2 * p
    HWp = H * Wp
    max_shift = (K - 1) * Wp + (K - 1)
    n_rows = ((HWp + max_shift + 7) // 8) * 8   # flat rows incl. shift slack
    KKC = K * K * C

    IMGS = _choose_imgs(B)
    n_steps = (B + IMGS - 1) // IMGS            # >= 2 whenever B >= 2
    B_pad = n_steps * IMGS
    IMGS_PAD = max(8, ((IMGS + 7) // 8) * 8)    # sublane-dense output tile

    x_flat = _prepare_x(x, K, n_rows, B_pad)               # [B_pad, n_rows, C]
    w_packed, whead = _prepare_params(w_conv, w_head, bias)

    kernel = _make_kernel(H, W, Wp, C, K, F, IMGS, IMGS_PAD)

    out = pl.pallas_call(
        kernel,
        out_shape=jax.ShapeDtypeStruct((n_steps, IMGS_PAD, NC_PAD), jnp.float32),
        grid_spec=pltpu.PrefetchScalarGridSpec(
            num_scalar_prefetch=0,
            grid=(n_steps,),
            in_specs=[
                # IMGS flattened halo images per grid step (double-buffered).
                pl.BlockSpec((IMGS, n_rows, C), lambda s: (s, 0, 0)),
                # weights: constant index maps -> fetched once, stay resident.
                pl.BlockSpec((KKC, F_PAD), lambda s: (0, 0)),
                pl.BlockSpec((F_PAD, NC_PAD), lambda s: (0, 0)),
            ],
            out_specs=pl.BlockSpec((1, IMGS_PAD, NC_PAD), lambda s: (s, 0, 0)),
            scratch_shapes=[
                pltpu.VMEM((HWp, KKC), jnp.bfloat16),       # im2col (~20 KiB)
                pltpu.VMEM((IMGS_PAD, F_PAD), jnp.float32),  # pooled rows
            ],
        ),
        compiler_params=pltpu.CompilerParams(
            dimension_semantics=("parallel",)),   # v7x: shard steps over 2 TCs
    )(x_flat, w_packed, whead)

    logits = out[:, :IMGS, :NC].reshape(n_steps * IMGS, NC)
    return logits[:B]


# ------------------------------ references --------------------------------- #
def _reference_matched(x, w_conv, w_head, bias):
    """Pure-JAX reference using the same bf16 quantization points as the kernel."""
    B, C, H, W = x.shape
    F, _, K, _ = w_conv.shape
    NC = w_head.shape[0]
    p = K // 2
    xh = jnp.transpose(x, (0, 2, 3, 1))
    xp = jnp.pad(xh, ((0, 0), (p, p), (p, p), (0, 0)))
    xp = xp.astype(jnp.bfloat16).astype(jnp.float32)
    w_packed, whead = _prepare_params(w_conv, w_head, bias)
    taps = w_packed.reshape(K * K, C, F_PAD).astype(jnp.float32)
    whead = whead.astype(jnp.float32)
    conv = jnp.zeros((B, H, W, F_PAD), jnp.float32)
    for t in range(K * K):
        di, dj = t // K, t % K
        win = xp[:, di:di + H, dj:dj + W, :]
        conv = conv + jnp.einsum("bhwc,cf->bhwf", win, taps[t],
                                 precision=jax.lax.Precision.HIGHEST)
    act = jnp.maximum(conv, 0.0)
    act = act.astype(jnp.bfloat16).astype(jnp.float32)      # pooling MXU operand
    pooled = jnp.mean(act, axis=(1, 2))                     # [B, F_PAD]
    pooled = pooled.at[:, F].set(1.0)
    pooled = pooled.astype(jnp.bfloat16).astype(jnp.float32)
    logits = jnp.dot(pooled, whead, precision=jax.lax.Precision.HIGHEST)
    return logits[:, :NC]


def _reference_f32(x, w_conv, w_head, bias):
    """Straight f32 reference of the module math (conv->ReLU->GAP->linear)."""
    conv = jax.lax.conv_general_dilated(
        x, w_conv, window_strides=(1, 1), padding="SAME",
        dimension_numbers=("NCHW", "OIHW", "NCHW"),
        precision=jax.lax.Precision.HIGHEST)
    act = jnp.maximum(conv, 0.0)
    pooled = jnp.mean(act, axis=(2, 3))                     # [B, F]
    return jnp.dot(pooled, w_head.T,
                   precision=jax.lax.Precision.HIGHEST) + bias[None, :]


# --------------------------------- main ------------------------------------ #
if __name__ == "__main__":
    B, C, H, W = 2, 4, 16, 16
    F, K, NC = 8, 3, 2

    key = jax.random.PRNGKey(0)
    kx, kw1, kw2, kb = jax.random.split(key, 4)

    x = jax.random.normal(kx, (B, C, H, W), dtype=jnp.float32)
    # Deterministic synthetic parameters (kaiming-ish scaling).
    w_conv = jax.random.normal(kw1, (F, C, K, K), jnp.float32) * (
        2.0 / (C * K * K)) ** 0.5
    w_head = jax.random.normal(kw2, (NC, F), jnp.float32) * (2.0 / F) ** 0.5
    bias = jax.random.normal(kb, (NC,), jnp.float32) * 0.01

    out = jax.block_until_ready(model_base_forward(x, w_conv, w_head, bias))
    assert out.shape == (B, NC)

    # Tight check against a reference that uses the kernel's exact bf16
    # quantization points (only f32 accumulation-order differences remain).
    ref_m = _reference_matched(x, w_conv, w_head, bias)
    assert jnp.allclose(out, ref_m, atol=1e-3, rtol=1e-3), \
        "mismatch vs matched-precision reference"

    # Loose semantic check against the plain f32 module math (bf16 rounding
    # of inputs/weights/activations is the only difference).
    ref_f = _reference_f32(x, w_conv, w_head, bias)
    assert jnp.allclose(out, ref_f, atol=5e-2, rtol=5e-2), \
        "mismatch vs f32 reference"

    print("KERNEL_OK")
</pallas_src>

<mosaic_0001>
module attributes {stable_mosaic.version = 11 : i64} {
  func.func @kernel(%arg0: i32, %arg1: memref<1x328x4xbf16, #tpu.memory_space<vmem>>, %arg2: memref<36x128xbf16, #tpu.memory_space<vmem>>, %arg3: memref<128x128xbf16, #tpu.memory_space<vmem>>, %arg4: memref<1x8x128xf32, #tpu.memory_space<vmem>>, %arg5: memref<288x36xbf16, #tpu.memory_space<vmem>>, %arg6: memref<8x128xf32, #tpu.memory_space<vmem>>) attributes {dimension_semantics = [#tpu.dimension_semantics<parallel>], iteration_bounds = array<i64: 2>, scalar_prefetch = 0 : i64, scratch_operands = 2 : i64, tpu.core_type = #tpu.core_type<tc>, window_params = [{transform_indices = @transform_0, window_bounds = array<i64: 1, 328, 4>}, {pipeline_mode = #tpu.pipeline_mode<synchronous>, transform_indices = @transform_1, window_bounds = array<i64: 36, 128>}, {pipeline_mode = #tpu.pipeline_mode<synchronous>, transform_indices = @transform_2, window_bounds = array<i64: 128, 128>}, {transform_indices = @transform_3, window_bounds = array<i64: 1, 8, 128>}]} {
    %0 = tpu.iota {dimensions = array<i32: 1>} : vector<1x288xi32>
    %c18_i32 = arith.constant 18 : i32
    %c0_i32 = arith.constant 0 : i32
    %1 = arith.cmpi eq, %c18_i32, %c0_i32 : i32
    %c1_i32 = arith.constant 1 : i32
    %2 = arith.select %1, %c1_i32, %c18_i32 : i32
    %3 = vector.broadcast %2 : i32 to vector<1x288xi32>
    %4 = arith.remsi %0, %3 : vector<1x288xi32>
    %c0_i32_0 = arith.constant 0 : i32
    %5 = vector.broadcast %c0_i32_0 : i32 to vector<1x288xi32>
    %6 = arith.cmpi ne, %4, %5 : vector<1x288xi32>
    %c0_i32_1 = arith.constant 0 : i32
    %7 = vector.broadcast %c0_i32_1 : i32 to vector<1x288xi32>
    %8 = arith.cmpi slt, %4, %7 : vector<1x288xi32>
    %c0_i32_2 = arith.constant 0 : i32
    %9 = arith.cmpi slt, %2, %c0_i32_2 : i32
    %10 = vector.broadcast %9 : i1 to vector<1x288xi1>
    %11 = vector.broadcast %10 : vector<1x288xi1> to vector<1x288xi1>
    %12 = arith.xori %8, %11 : vector<1x288xi1>
    %13 = arith.andi %12, %6 : vector<1x288xi1>
    %14 = vector.broadcast %2 : i32 to vector<1x288xi32>
    %15 = arith.addi %4, %14 : vector<1x288xi32>
    %16 = arith.select %13, %15, %4 : vector<1x288xi1>, vector<1x288xi32>
    %c16_i32 = arith.constant 16 : i32
    %17 = vector.broadcast %c16_i32 : i32 to vector<1x288xi32>
    %18 = arith.cmpi slt, %16, %17 : vector<1x288xi32>
    %cst = arith.constant 3.906250e-03 : f32
    %cst_3 = arith.constant 0.000000e+00 : f32
    %19 = vector.broadcast %cst : f32 to vector<1x288xf32>
    %20 = vector.broadcast %cst_3 : f32 to vector<1x288xf32>
    %21 = arith.select %18, %19, %20 : vector<1x288xi1>, vector<1x288xf32>
    %22 = arith.truncf %21 : vector<1x288xf32> to vector<1x288xbf16>
    %cst_4 = arith.constant 0.000000e+00 : f32
    %23 = vector.broadcast %cst_4 : f32 to vector<8x128xf32>
    %c0 = arith.constant 0 : index
    %c0_5 = arith.constant 0 : index
    %24 = vector.load %arg6[%c0, %c0_5] : memref<8x128xf32, #tpu.memory_space<vmem>>, vector<8x128xf32>
    tpu.vector_store %arg6[%c0, %c0_5], %23 {strides = array<i32>} : memref<8x128xf32, #tpu.memory_space<vmem>>, vector<8x128xf32>,
    %c0_6 = arith.constant 0 : index
    %c0_7 = arith.constant 0 : index
    %c0_8 = arith.constant 0 : index
    %25 = vector.load %arg1[%c0_6, %c0_7, %c0_8] : memref<1x328x4xbf16, #tpu.memory_space<vmem>>, vector<1x288x4xbf16>
    %26 = vector.shape_cast %25 : vector<1x288x4xbf16> to vector<288x4xbf16>
    %c0_9 = arith.constant 0 : index
    %c0_10 = arith.constant 0 : index
    %27 = vector.load %arg5[%c0_9, %c0_10] : memref<288x36xbf16, #tpu.memory_space<vmem>>, vector<288x4xbf16>
    tpu.vector_store %arg5[%c0_9, %c0_10], %26 {strides = array<i32>} : memref<288x36xbf16, #tpu.memory_space<vmem>>, vector<288x4xbf16>,
    %c0_11 = arith.constant 0 : index
    %c1 = arith.constant 1 : index
    %c0_12 = arith.constant 0 : index
    %28 = vector.load %arg1[%c0_11, %c1, %c0_12] : memref<1x328x4xbf16, #tpu.memory_space<vmem>>, vector<1x288x4xbf16>
    %29 = vector.shape_cast %28 : vector<1x288x4xbf16> to vector<288x4xbf16>
    %c0_13 = arith.constant 0 : index
    %c4 = arith.constant 4 : index
    %30 = vector.load %arg5[%c0_13, %c4] : memref<288x36xbf16, #tpu.memory_space<vmem>>, vector<288x4xbf16>
    tpu.vector_store %arg5[%c0_13, %c4], %29 {strides = array<i32>} : memref<288x36xbf16, #tpu.memory_space<vmem>>, vector<288x4xbf16>,
    %c0_14 = arith.constant 0 : index
    %c2 = arith.constant 2 : index
    %c0_15 = arith.constant 0 : index
    %31 = vector.load %arg1[%c0_14, %c2, %c0_15] : memref<1x328x4xbf16, #tpu.memory_space<vmem>>, vector<1x288x4xbf16>
    %32 = vector.shape_cast %31 : vector<1x288x4xbf16> to vector<288x4xbf16>
    %c0_16 = arith.constant 0 : index
    %c8 = arith.constant 8 : index
    %33 = vector.load %arg5[%c0_16, %c8] : memref<288x36xbf16, #tpu.memory_space<vmem>>, vector<288x4xbf16>
    tpu.vector_store %arg5[%c0_16, %c8], %32 {strides = array<i32>} : memref<288x36xbf16, #tpu.memory_space<vmem>>, vector<288x4xbf16>,
    %c0_17 = arith.constant 0 : index
    %c18 = arith.constant 18 : index
    %c0_18 = arith.constant 0 : index
    %34 = vector.load %arg1[%c0_17, %c18, %c0_18] : memref<1x328x4xbf16, #tpu.memory_space<vmem>>, vector<1x288x4xbf16>
    %35 = vector.shape_cast %34 : vector<1x288x4xbf16> to vector<288x4xbf16>
    %c0_19 = arith.constant 0 : index
    %c12 = arith.constant 12 : index
    %36 = vector.load %arg5[%c0_19, %c12] : memref<288x36xbf16, #tpu.memory_space<vmem>>, vector<288x4xbf16>
    tpu.vector_store %arg5[%c0_19, %c12], %35 {strides = array<i32>} : memref<288x36xbf16, #tpu.memory_space<vmem>>, vector<288x4xbf16>,
    %c0_20 = arith.constant 0 : index
    %c19 = arith.constant 19 : index
    %c0_21 = arith.constant 0 : index
    %37 = vector.load %arg1[%c0_20, %c19, %c0_21] : memref<1x328x4xbf16, #tpu.memory_space<vmem>>, vector<1x288x4xbf16>
    %38 = vector.shape_cast %37 : vector<1x288x4xbf16> to vector<288x4xbf16>
    %c0_22 = arith.constant 0 : index
    %c16 = arith.constant 16 : index
    %39 = vector.load %arg5[%c0_22, %c16] : memref<288x36xbf16, #tpu.memory_space<vmem>>, vector<288x4xbf16>
    tpu.vector_store %arg5[%c0_22, %c16], %38 {strides = array<i32>} : memref<288x36xbf16, #tpu.memory_space<vmem>>, vector<288x4xbf16>,
    %c0_23 = arith.constant 0 : index
    %c20 = arith.constant 20 : index
    %c0_24 = arith.constant 0 : index
    %40 = vector.load %arg1[%c0_23, %c20, %c0_24] : memref<1x328x4xbf16, #tpu.memory_space<vmem>>, vector<1x288x4xbf16>
    %41 = vector.shape_cast %40 : vector<1x288x4xbf16> to vector<288x4xbf16>
    %c0_25 = arith.constant 0 : index
    %c20_26 = arith.constant 20 : index
    %42 = vector.load %arg5[%c0_25, %c20_26] : memref<288x36xbf16, #tpu.memory_space<vmem>>, vector<288x4xbf16>
    tpu.vector_store %arg5[%c0_25, %c20_26], %41 {strides = array<i32>} : memref<288x36xbf16, #tpu.memory_space<vmem>>, vector<288x4xbf16>,
    %c0_27 = arith.constant 0 : index
    %c36 = arith.constant 36 : index
    %c0_28 = arith.constant 0 : index
    %43 = vector.load %arg1[%c0_27, %c36, %c0_28] : memref<1x328x4xbf16, #tpu.memory_space<vmem>>, vector<1x288x4xbf16>
    %44 = vector.shape_cast %43 : vector<1x288x4xbf16> to vector<288x4xbf16>
    %c0_29 = arith.constant 0 : index
    %c24 = arith.constant 24 : index
    %45 = vector.load %arg5[%c0_29, %c24] : memref<288x36xbf16, #tpu.memory_space<vmem>>, vector<288x4xbf16>
    tpu.vector_store %arg5[%c0_29, %c24], %44 {strides = array<i32>} : memref<288x36xbf16, #tpu.memory_space<vmem>>, vector<288x4xbf16>,
    %c0_30 = arith.constant 0 : index
    %c37 = arith.constant 37 : index
    %c0_31 = arith.constant 0 : index
    %46 = vector.load %arg1[%c0_30, %c37, %c0_31] : memref<1x328x4xbf16, #tpu.memory_space<vmem>>, vector<1x288x4xbf16>
    %47 = vector.shape_cast %46 : vector<1x288x4xbf16> to vector<288x4xbf16>
    %c0_32 = arith.constant 0 : index
    %c28 = arith.constant 28 : index
    %48 = vector.load %arg5[%c0_32, %c28] : memref<288x36xbf16, #tpu.memory_space<vmem>>, vector<288x4xbf16>
    tpu.vector_store %arg5[%c0_32, %c28], %47 {strides = array<i32>} : memref<288x36xbf16, #tpu.memory_space<vmem>>, vector<288x4xbf16>,
    %c0_33 = arith.constant 0 : index
    %c38 = arith.constant 38 : index
    %c0_34 = arith.constant 0 : index
    %49 = vector.load %arg1[%c0_33, %c38, %c0_34] : memref<1x328x4xbf16, #tpu.memory_space<vmem>>, vector<1x288x4xbf16>
    %50 = vector.shape_cast %49 : vector<1x288x4xbf16> to vector<288x4xbf16>
    %c0_35 = arith.constant 0 : index
    %c32 = arith.constant 32 : index
    %51 = vector.load %arg5[%c0_35, %c32] : memref<288x36xbf16, #tpu.memory_space<vmem>>, vector<288x4xbf16>
    tpu.vector_store %arg5[%c0_35, %c32], %50 {strides = array<i32>} : memref<288x36xbf16, #tpu.memory_space<vmem>>, vector<288x4xbf16>,
    %c0_36 = arith.constant 0 : index
    %c0_37 = arith.constant 0 : index
    %52 = vector.load %arg5[%c0_36, %c0_37] : memref<288x36xbf16, #tpu.memory_space<vmem>>, vector<288x36xbf16>
    %c0_38 = arith.constant 0 : index
    %c0_39 = arith.constant 0 : index
    %53 = vector.load %arg2[%c0_38, %c0_39] : memref<36x128xbf16, #tpu.memory_space<vmem>>, vector<36x128xbf16>
    %cst_40 = arith.constant dense<0.000000e+00> : vector<288x128xf32>
    %54 = tpu.matmul %52, %53, %cst_40 {dimension_numbers = #tpu.dot_dimension_numbers<[1], [0], [0], [1], [0, 0, 1, 1], [], []>} : vector<288x36xbf16>, vector<36x128xbf16>, vector<288x128xf32> -> vector<288x128xf32>
    %cst_41 = arith.constant 0.000000e+00 : f32
    %55 = vector.broadcast %cst_41 : f32 to vector<288x128xf32>
    %56 = arith.maximumf %54, %55 : vector<288x128xf32>
    %57 = arith.truncf %56 : vector<288x128xf32> to vector<288x128xbf16>
    %cst_42 = arith.constant dense<0.000000e+00> : vector<1x128xf32>
    %58 = tpu.matmul %22, %57, %cst_42 {dimension_numbers = #tpu.dot_dimension_numbers<[1], [0], [0], [1], [0, 0, 1, 1], [], []>} : vector<1x288xbf16>, vector<288x128xbf16>, vector<1x128xf32> -> vector<1x128xf32>
    %c0_43 = arith.constant 0 : index
    %c0_44 = arith.constant 0 : index
    %59 = vector.load %arg6[%c0_43, %c0_44] : memref<8x128xf32, #tpu.memory_space<vmem>>, vector<1x128xf32>
    tpu.vector_store %arg6[%c0_43, %c0_44], %58 {strides = array<i32>} : memref<8x128xf32, #tpu.memory_space<vmem>>, vector<1x128xf32>,
    %c0_45 = arith.constant 0 : index
    %c0_46 = arith.constant 0 : index
    %60 = vector.load %arg6[%c0_45, %c0_46] : memref<8x128xf32, #tpu.memory_space<vmem>>, vector<8x128xf32>
    %61 = tpu.iota {dimensions = array<i32: 1>} : vector<8x128xi32>
    %c8_i32 = arith.constant 8 : i32
    %62 = vector.broadcast %c8_i32 : i32 to vector<8x128xi32>
    %63 = arith.cmpi eq, %61, %62 : vector<8x128xi32>
    %cst_47 = arith.constant 1.000000e+00 : f32
    %64 = vector.broadcast %cst_47 : f32 to vector<8x128xf32>
    %65 = arith.select %63, %64, %60 : vector<8x128xi1>, vector<8x128xf32>
    %66 = arith.truncf %65 : vector<8x128xf32> to vector<8x128xbf16>
    %c0_48 = arith.constant 0 : index
    %c0_49 = arith.constant 0 : index
    %67 = vector.load %arg3[%c0_48, %c0_49] : memref<128x128xbf16, #tpu.memory_space<vmem>>, vector<128x128xbf16>
    %cst_50 = arith.constant dense<0.000000e+00> : vector<8x128xf32>
    %68 = tpu.matmul %66, %67, %cst_50 {dimension_numbers = #tpu.dot_dimension_numbers<[1], [0], [0], [1], [0, 0, 1, 1], [], []>} : vector<8x128xbf16>, vector<128x128xbf16>, vector<8x128xf32> -> vector<8x128xf32>
    %c0_51 = arith.constant 0 : index
    %c0_52 = arith.constant 0 : index
    %c0_53 = arith.constant 0 : index
    %69 = vector.load %arg4[%c0_51, %c0_52, %c0_53] : memref<1x8x128xf32, #tpu.memory_space<vmem>>, vector<1x8x128xf32>
    %70 = vector.shape_cast %69 : vector<1x8x128xf32> to vector<8x128xf32>
    %71 = vector.shape_cast %68 : vector<8x128xf32> to vector<1x8x128xf32>
    tpu.vector_store %arg4[%c0_51, %c0_52, %c0_53], %71 {strides = array<i32>} : memref<1x8x128xf32, #tpu.memory_space<vmem>>, vector<1x8x128xf32>,
    return
  }
  func.func @transform_0(%arg0: i32) -> (i32, i32, i32) {
    %c0_i32 = arith.constant 0 : i32
    %c0_i32_0 = arith.constant 0 : i32
    %c0_i32_1 = arith.constant 0 : i32
    return %arg0, %c0_i32, %c0_i32_0 : i32, i32, i32
  }
  func.func @transform_1(%arg0: i32) -> (i32, i32) {
    %c0_i32 = arith.constant 0 : i32
    %c0_i32_0 = arith.constant 0 : i32
    %c0_i32_1 = arith.constant 0 : i32
    return %c0_i32, %c0_i32_0 : i32, i32
  }
  func.func @transform_2(%arg0: i32) -> (i32, i32) {
    %c0_i32 = arith.constant 0 : i32
    %c0_i32_0 = arith.constant 0 : i32
    %c0_i32_1 = arith.constant 0 : i32
    return %c0_i32, %c0_i32_0 : i32, i32
  }
  func.func @transform_3(%arg0: i32) -> (i32, i32, i32) {
    %c0_i32 = arith.constant 0 : i32
    %c0_i32_0 = arith.constant 0 : i32
    %c0_i32_1 = arith.constant 0 : i32
    return %arg0, %c0_i32, %c0_i32_0 : i32, i32, i32
  }
}

</mosaic_0001>

<bundles_post_ra>
// kernel: model_base_forward.1
= control target key start
LH: loop header
LB: loop body
LE: loop exit
PB: predicated region body
PF: predicated region fallthrough
CT: control target
= control target key end

     0   :  { %s3858_s12 = smov 0   ;;  %s5033_s0 = inlined_call_operand.vmem [shape: bf16[2,328,4], index: 0, kind: input, shape index: {}]   ;;  %s5034_s1 = inlined_call_operand.vmem [shape: bf16[36,128], index: 1, kind: input, shape index: {}]   ;;  %s5035_s2 = inlined_call_operand.vmem [shape: bf16[128,128], index: 2, kind: input, shape index: {}]   ;;  %s5036_s3 = inlined_call_operand.vmem [shape: f32[2,8,128], index: 3, kind: output, shape index: {}]  }
   0x1 LB: > { %s3273_s13 = sadd.s32 4294967295, %s3825_s12   ;;  %p3277_p0 = scmp.ge.s32.totalorder %s3825_s12, 1  ;;  %s3825_s12 = sphi %s3858_s12, %s13_s12  }
   0x2   : > { %p137_p1 = scmp.lt.s32.totalorder %s3825_s12, 3 }
   0x4   : > { %p138_p2 = pnand %p3277_p0, %p137_p1 }
   0x5   : > { %p160_p3 = scmp.lt.s32.totalorder (!%p138_p2), %s3273_s13, 1  ;;  %vm877_vm0 = vcmask (!%p138_p2), 1046528   ;;  %vm1732_vm1 = vcmask (!%p138_p2), 1045504   ;;  %s3827_s18 = smov (!%p138_p2), 12   ;;  %vm525_vm2 = vsmask.f32 (!%p138_p2), 7424 }
   0x6   : > { %141 = sbr.rel (%p138_p2) target bundleno = 1095 (0x447), region = 32  ;;  %s3828_s19 = smov (!%p138_p2), 8   ;;  %vm1358_vm3 = vsmask.f32 (!%p138_p2), 6400  ;;  %vm2213_vm4 = vsmask.f32 (!%p138_p2), 5376 }
   0x7   : > { %s3829_s20 = smov (!%p138_p2), 20   ;;  %s3830_s21 = smov (!%p138_p2), 4   ;;  %vm2587_vm5 = vcmask (!%p138_p2), 1044480   ;;  %vm376_vm6 = vcmask (!%p138_p2), 31744   ;;  %vm2791_vm7 = vcmask (!%p138_p2), 1041408   ;;  %vm728_vm8 = vcmask (!%p138_p2), 64544  }
   0x8   : > { %s3831_s22 = smov (!%p138_p2), 16   ;;  %s3832_s23 = smov (!%p138_p2), 24   ;;  %vm969_vm9 = vcmask (!%p138_p2), 97344   ;;  %vm1209_vm10 = vcmask (!%p138_p2), 130144   ;;  %vm1583_vm11 = vcmask (!%p138_p2), 162944   ;;  %vm1824_vm12 = vcmask (!%p138_p2), 195744  }
   0x9   : > { %s3833_s24 = smov (!%p138_p2), 28   ;;  %s3834_s25 = smov (!%p138_p2), 32   ;;  %vm2064_vm13 = vcmask (!%p138_p2), 228544   ;;  %vm2438_vm14 = vcmask (!%p138_p2), 261344   ;;  %vm2679_vm15 = vcmask (!%p138_p2), 294144  }
   0xd   : > { %s5038_s13 = smov (!%p160_p3, %s3273_s13), 1 }
   0xe   : > { %s3612_s14 = smul.u32 164, %s5038_s13 }
  0x10   : > { %s3872_s17 = scalar_lea.vmem %s5033_s0, %s3612_s14 }
  0x11   : > { %v3638_v0 = vld [vmem:[%s3872_s17 + $0x8] sm:$0xfe]   ;;  %v3639_v1 = vld [vmem:[%s3872_s17 + $0x10] sm:$0xff]   ;;  %v3640_v4 = vld [vmem:[%s3872_s17] sm:$0xfe]  }
  0x12   : > { %v1118_v2 = vrot.slane %v3638_v0, 1  ;;  %v1119_v3 = vrot.slane %v3639_v1, 1  ;;  %v3641_v5 = vld [vmem:[%s3872_s17 + $0x8] sm:$0xff]   ;;  %v878_v7 = vrot.slane %v3640_v4, 1  ;;  %v3643_v8 = vld [vmem:[%s3872_s17 + $0x10] sm:$0xff]   ;;  %v3886_v13 = vld [vmem:[%s3872_s17 + $0x18] sm:$0xff]  }
  0x13   : > { %v879_v9 = vrot.slane %v3641_v5, 1  ;;  %v3642_v10 = vld [vmem:[%s3872_s17 + $0x8] sm:$0xfc]   ;;  %v3883_v11 = vld [vmem:[%s3872_s17 + $0x10] sm:$0xff]   ;;  %v1734_v12 = vrot.slane %v3643_v8, 2  ;;  %v3646_v17 = vld [vmem:[%s3872_s17] sm:$0xff]  }
  0x14   : > { %v1120_v6 = vsel %vm877_vm0, %v1118_v2, %v1119_v3  ;;  %v1733_v15 = vrot.slane %v3642_v10, 2  ;;  %v881_v16 = vrot.slane %v3883_v11, 1  ;;  %v1121_v20 = vrot.slane %v3886_v13, 1  ;;  %v3647_v21 = vld [vmem:[%s3872_s17 + $0x8] sm:$0xff]   ;;  %v3900_v24 = vld [vmem:[%s3872_s17 + $0x18] sm:$0xff]   ;;  %v3903_v25 = vld [vmem:[%s3872_s17 + $0x10] sm:$0xff]  }
  0x15   : > { %1155 = vrot.lane.b32.xlu0 %v1120_v6, %s3827_s18  ;;  %v880_v14 = vsel %vm877_vm0, %v878_v7, %v879_v9  ;;  %v527_v22 = vshrl.u32 %v3646_v17, 16  ;;  %v529_v23 = vshll.u32 %v3646_v17, 16  ;;  %v534_v26 = vshll.u32 %v3647_v21, 16  ;;  %v3650_v31 = vld [vmem:[%s3872_s17 + $0x10] sm:$0xff]   ;;  %v3651_v34 = vld [vmem:[%s3872_s17 + $0x18] sm:$0xff]   ;;  %v3920_v46 = vld [vmem:[%s3872_s17 + $0x20] sm:$0xff]  }
  0x16   : > { %915 = vrot.lane.b32.xlu1 %v880_v14, %s3828_s19  ;;  %v1735_v18 = vsel %vm1732_vm1, %v1733_v15, %v1734_v12  ;;  %v882_v19 = vsel %vm877_vm0, %v879_v9, %v881_v16  ;;  %v538_v27 = vshrl.u32 %v3647_v21, 16  ;;  %v1736_v29 = vrot.slane %v3900_v24, 2  ;;  %v3654_v42 = vld [vmem:[%s3872_s17 + $0x18] sm:$0xff]   ;;  %v3652_v45 = vld [vmem:[%s3872_s17 + $0x8] sm:$0xfe]   ;;  %v3658_v4 = vld [vmem:[%s3872_s17 + $0x20] sm:$0xff]  }
  0x17   : > { %v531_v28 = vrot.slane %v529_v23, 1  ;;  %v542_v30 = vshll.u32 %v3903_v25, 16  ;;  %v1122_v32 = vsel %vm877_vm0, %v1119_v3, %v1121_v20  ;;  %v536_v33 = vrot.slane %v534_v26, 1  ;;  %v3657_v51 = vld [vmem:[%s3872_s17 + $0x18] sm:$0xff]   ;;  %v3653_v57 = vld [vmem:[%s3872_s17 + $0x10] sm:$0xfc]  }
  0x18   : > { %v1368_v37 = vshrl.u32 %v3650_v31, 16  ;;  %v1371_v39 = vshll.u32 %v3650_v31, 16  ;;  %v1377_v40 = vshrl.u32 %v3651_v34, 16  ;;  %v1380_v41 = vshll.u32 %v3651_v34, 16  ;;  %v3656_v2 = vld [vmem:[%s3872_s17 + $0x10] sm:$0xfc]  }
  0x19   : > { %1770 = vrot.lane.b32.xlu0 %v1735_v18, %s3829_s20  ;;  %v532_v35 = vor.u32 %v531_v28, %v527_v22  ;;  %v3913_v36 = vrot.slane %v542_v30, 1  ;;  %v540_v38 = vor.u32 %v538_v27, %v536_v33  ;;  %v1737_v47 = vsel %vm1732_vm1, %v1734_v12, %v1736_v29  ;;  %v3940_v6 = vld [vmem:[%s3872_s17 + $0x18] sm:$0xff]   ;;  %v3659_v23 = vld [vmem:[%s3872_s17 + $0x10] sm:$0xf8]  }
  0x1a   : > { %917 = vrot.lane.b32.xlu1 %v882_v19, %s3828_s19  ;;  %v1370_v44 = vrot.slane %v1368_v37, 1  ;;  %v1373_v48 = vrot.slane %v1371_v39, 2  ;;  %v1379_v49 = vrot.slane %v1377_v40, 1  ;;  %v1382_v50 = vrot.slane %v1380_v41, 2  ;;  %v3661_v12 = vld [vmem:[%s3872_s17 + $0x18] sm:$0xff]   ;;  %v3959_v37 = vld [vmem:[%s3872_s17 + $0x20] sm:$0xff]  }
  0x1b   : > { %v537_v43 = vsel %vm525_vm2, %v532_v35, %v536_v33  ;;  %v545_v52 = vsel %vm525_vm2, %v540_v38, %v3913_v36  ;;  %v1360_v53 = vshrl.u32 %v3652_v45, 16  ;;  %v1363_v54 = vshll.u32 %v3652_v45, 16  ;;  %v3963_v40 = vld [vmem:[%s3872_s17 + $0x20] sm:$0xff]  }
  0x1c   : > { %v1374_v55 = vor.u32 %v1373_v48, %v1370_v44  ;;  %v3929_v56 = vor.u32 %v1382_v50, %v1379_v49  ;;  %v1974_v58 = vrot.slane %v3654_v42, 2  ;;  %v1976_v59 = vrot.slane %v3920_v46, 2  ;;  %v3664_v42 = vld [vmem:[%s3872_s17 + $0x18] sm:$0xff]  }
  0x1d   : > { %674 = vrot.lane.b32.xlu0 %v537_v43, %s3830_s21  ;;  %v1362_v60 = vrot.slane %v1360_v53, 1  ;;  %v1365_v61 = vrot.slane %v1363_v54, 2  ;;  %v1973_v63 = vrot.slane %v3653_v57, 2  ;;  %v2223_v0 = vshrl.u32 %v3657_v51, 16  ;;  %v3971_v43 = vld [vmem:[%s3872_s17 + $0x20] sm:$0xff]   ;;  %v3669_v54 = vld [vmem:[%s3872_s17 + $0x28] sm:$0xff]  }
  0x1e   : > { %1157 = vrot.lane.b32.xlu1 %v1122_v32, %s3827_s18  ;;  %v1384_v62 = vsel %vm1358_vm3, %v1374_v55, %v3929_v56  ;;  %v2226_v3 = vshll.u32 %v3657_v51, 16  ;;  %v2215_v8 = vshrl.u32 %v3656_v2, 16  ;;  %v2218_v9 = vshll.u32 %v3656_v2, 16  ;;  %v3981_v51 = vld [vmem:[%s3872_s17 + $0x28] sm:$0xff]  }
  0x1f   : > { %v1366_v1 = vor.u32 %v1365_v61, %v1362_v60  ;;  %v2225_v5 = vrot.slane %v2223_v0, 2  ;;  %v1977_v14 = vsel %vm1732_vm1, %v1974_v58, %v1976_v59  ;;  %v2232_v15 = vshrl.u32 %v3658_v4, 16 }
  0x20   : > { %v2228_v10 = vrot.slane %v2226_v3, 3  ;;  %v2235_v17 = vshll.u32 %v3658_v4, 16  ;;  %v1975_v18 = vsel %vm1732_vm1, %v1973_v63, %v1974_v58  ;;  %v2217_v19 = vrot.slane %v2215_v8, 2  ;;  %v3670_v8 = vld [vmem:[%s3872_s17 + $0x20] sm:$0xff]  }
  0x21   : > { %676 = vrot.lane.b32.xlu0 %v545_v52, %s3830_s21  ;;  %v1375_v7 = vsel %vm1358_vm3, %v1366_v1, %v1374_v55  ;;  %v2220_v21 = vrot.slane %v2218_v9, 3  ;;  %v2234_v26 = vrot.slane %v2232_v15, 2  ;;  %v2589_v28 = vrot.slane %v3940_v6, 3  ;;  %v3668_v52 = vld [vmem:[%s3872_s17 + $0x20] sm:$0xff]   ;;  %v4004_v9 = vld [vmem:[%s3872_s17 + $0x28] sm:$0xff]  }
  0x22   : > { %1772 = vrot.lane.b32.xlu1 %v1737_v47, %s3829_s20  ;;  %v2229_v22 = vor.u32 %v2228_v10, %v2225_v5  ;;  %v2237_v27 = vrot.slane %v2235_v17, 3  ;;  %v546_v30 = vshrl.u32 %v3903_v25, 16  ;;  %v2588_v32 = vrot.slane %v3659_v23, 3  ;;  %v3666_v47 = vld [vmem:[%s3872_s17 + $0x20] sm:$0xff]   ;;  %v3674_v10 = vld [vmem:[%s3872_s17 + $0x28] sm:$0xff]   ;;  %v3675_v17 = vld [vmem:[%s3872_s17 + $0x30] sm:$0xff]  }
  0x23   : > { %v2221_v31 = vor.u32 %v2220_v21, %v2217_v19  ;;  %v550_v33 = vshll.u32 %v3661_v12, 16  ;;  %v554_v38 = vshrl.u32 %v3661_v12, 16  ;;  %v2591_v49 = vrot.slane %v3959_v37, 3  ;;  %v3672_v19 = vld [vmem:[%s3872_s17 + $0x28] sm:$0xff]   ;;  %v4021_v21 = vld [vmem:[%s3872_s17 + $0x30] sm:$0xff]  }
  0x24   : > { %v3955_v34 = vor.u32 %v2237_v27, %v2234_v26  ;;  %v548_v35 = vor.u32 %v546_v30, %v3913_v36  ;;  %v558_v36 = vshll.u32 %v3963_v40, 16  ;;  %v2590_v48 = vsel %vm2587_vm5, %v2588_v32, %v2589_v28  ;;  %v3677_v32 = vld [vmem:[%s3872_s17 + $0x28] sm:$0xff]  }
  0x25   : > { %1529 = vrot.lane.b32.xlu0 %v1375_v7, %s3831_s22  ;;  %v2230_v25 = vsel %vm2213_vm4, %v2221_v31, %v2229_v22  ;;  %v552_v39 = vrot.slane %v550_v33, 1  ;;  %v883_v53 = vrot.slane %v3664_v42, 1  ;;  %v885_v55 = vrot.slane %v3971_v43, 1 }
  0x26   : > { %1531 = vrot.lane.b32.xlu1 %v1384_v62, %s3831_s22  ;;  %v2239_v41 = vsel %vm2213_vm4, %v2229_v22, %v3955_v34  ;;  %v3978_v50 = vrot.slane %v558_v36, 1  ;;  %v1386_v57 = vshrl.u32 %v3668_v52, 16  ;;  %v1389_v60 = vshll.u32 %v3668_v52, 16 }
  0x27   : > { %v553_v44 = vsel %vm525_vm2, %v548_v35, %v552_v39  ;;  %v556_v45 = vor.u32 %v554_v38, %v552_v39  ;;  %v1395_v61 = vshrl.u32 %v3669_v54, 16  ;;  %v1398_v62 = vshll.u32 %v3669_v54, 16 }
  0x28   : > { %v2592_v63 = vsel %vm2587_vm5, %v2589_v28, %v2591_v49  ;;  %v1123_v0 = vrot.slane %v3666_v47, 1  ;;  %v1125_v1 = vrot.slane %v3981_v51, 1  ;;  %v1388_v2 = vrot.slane %v1386_v57, 1  ;;  %v3680_v57 = vld [vmem:[%s3872_s17 + $0x28] sm:$0xff]  }
  0x29   : > { %2010 = vrot.lane.b32.xlu0 %v1975_v18, %s3832_s23  ;;  %v561_v58 = vsel %vm525_vm2, %v556_v45, %v3978_v50  ;;  %v1391_v3 = vrot.slane %v1389_v60, 2  ;;  %v886_v4 = vsel %vm877_vm0, %v883_v53, %v885_v55  ;;  %v1397_v5 = vrot.slane %v1395_v61, 1  ;;  %v4048_v45 = vld [vmem:[%s3872_s17 + $0x30] sm:$0xff]  }
  0x2a   : > { %2012 = vrot.lane.b32.xlu1 %v1977_v14, %s3832_s23  ;;  %v1400_v6 = vrot.slane %v1398_v62, 2  ;;  %v884_v7 = vsel %vm877_vm0, %v881_v16, %v883_v53  ;;  %v1126_v12 = vsel %vm877_vm0, %v1123_v0, %v1125_v1  ;;  %v1124_v11 = vsel %vm877_vm0, %v1121_v20, %v1123_v0  ;;  %v3684_v60 = vld [vmem:[%s3872_s17 + $0x30] sm:$0xff]  }
  0x2b   : > { %v1392_v14 = vor.u32 %v1391_v3, %v1388_v2  ;;  %v1738_v16 = vrot.slane %v3670_v8, 2  ;;  %v1740_v18 = vrot.slane %v4004_v9, 2  ;;  %v2241_v22 = vshrl.u32 %v3674_v10, 16  ;;  %v3682_v3 = vld [vmem:[%s3872_s17 + $0x30] sm:$0xff]  }
  0x2c   : > { %v4012_v15 = vor.u32 %v1400_v6, %v1397_v5  ;;  %v2244_v23 = vshll.u32 %v3674_v10, 16  ;;  %v2250_v27 = vshrl.u32 %v3675_v17, 16  ;;  %v2253_v13 = vshll.u32 %v3675_v17, 16  ;;  %v4083_v5 = vld [vmem:[%s3872_s17 + $0x38] sm:$0xff]  }
  0x2d   : > { %2384 = vrot.lane.b32.xlu0 %v2230_v25, %s3833_s24  ;;  %v1393_v20 = vsel %vm1358_vm3, %v3929_v56, %v1392_v14  ;;  %v1978_v28 = vrot.slane %v3672_v19, 2  ;;  %v1741_v30 = vsel %vm1732_vm1, %v1738_v16, %v1740_v18  ;;  %v1980_v31 = vrot.slane %v4021_v21, 2 }
  0x2e   : > { %2386 = vrot.lane.b32.xlu1 %v2239_v41, %s3833_s24  ;;  %v1402_v26 = vsel %vm1358_vm3, %v1392_v14, %v4012_v15  ;;  %v2243_v33 = vrot.slane %v2241_v22, 2  ;;  %v2246_v35 = vrot.slane %v2244_v23, 3  ;;  %v2252_v38 = vrot.slane %v2250_v27, 2  ;;  %v4103_v27 = vld [vmem:[%s3872_s17 + $0x38] sm:$0xff]  }
  0x2f   : > { %v2255_v25 = vrot.slane %v2253_v13, 3  ;;  %v1739_v56 = vsel %vm1732_vm1, %v1736_v29, %v1738_v16  ;;  %v562_v39 = vshrl.u32 %v3963_v40, 16  ;;  %v1981_v41 = vsel %vm1732_vm1, %v1978_v28, %v1980_v31  ;;  %v3676_v29 = vld [vmem:[%s3872_s17 + $0x28] sm:$0xff]   ;;  %v4056_v40 = vld [vmem:[%s3872_s17 + $0x30] sm:$0xff]   ;;  %v3690_v13 = vld [vmem:[%s3872_s17 + $0x38] sm:$0xff]  }
  0x30   : > { %v2247_v42 = vor.u32 %v2246_v35, %v2243_v33  ;;  %v1979_v24 = vsel %vm1732_vm1, %v1976_v59, %v1978_v28  ;;  %v570_v47 = vshrl.u32 %v3677_v32, 16  ;;  %v574_v46 = vshll.u32 %v4048_v45, 16  ;;  %v3686_v16 = vld [vmem:[%s3872_s17 + $0x30] sm:$0xff]   ;;  %v3688_v35 = vld [vmem:[%s3872_s17 + $0x38] sm:$0xff]  }
  0x31   : > { %2625 = vrot.lane.b32.xlu0 %v2590_v48, %s3834_s25  ;;  %v4045_v36 = vor.u32 %v2255_v25, %v2252_v38  ;;  %v564_v52 = vor.u32 %v562_v39, %v3978_v50  ;;  %v2593_v54 = vrot.slane %v3676_v29, 3  ;;  %v2595_v0 = vrot.slane %v4056_v40, 3  ;;  %v4120_v38 = vld [vmem:[%s3872_s17 + $0x40] sm:$0xff]   ;;  %v3724_v40 = vld [vmem:[%s5034_s1 + $0x8] sm:$0xff]  }
  0x32   : > { %678 = vrot.lane.b32.xlu1 %v553_v44, %s3830_s21  ;;  %v566_v44 = vshll.u32 %v3677_v32, 16  ;;  %v2248_v59 = vsel %vm2213_vm4, %v3955_v34, %v2247_v42  ;;  %v4073_v62 = vrot.slane %v574_v46, 1  ;;  %v887_v2 = vrot.slane %v3680_v57, 1 }
  0x33   : > { %v2257_v48 = vsel %vm2213_vm4, %v2247_v42, %v4045_v36  ;;  %v2594_v34 = vsel %vm2587_vm5, %v2591_v49, %v2593_v54  ;;  %v1404_v6 = vshrl.u32 %v3684_v60, 16  ;;  %v2596_v10 = vsel %vm2587_vm5, %v2593_v54, %v2595_v0  ;;  %v3708_v42 = vld [vmem:[%s3872_s17] sm:$0xff]  }
  0x34   : > { %v568_v53 = vrot.slane %v566_v44, 1  ;;  %v1129_v14 = vrot.slane %v4083_v5, 1  ;;  %v1744_v33 = vrot.slane %v4103_v27, 2  ;;  %v2259_v25 = vshrl.u32 %v3690_v13, 16  ;;  %377 = vst.msk [vmem:[#allocation2] sm:$0xff] %vm376_vm6, %v3708_v42 }
  0x35   : > { %2627 = vrot.lane.b32.xlu0 %v2592_v63, %s3834_s25  ;;  %v3685_v63 = vld [vmem:[%s3872_s17 + $0x38] sm:$0xff]   ;;  %v1406_v17 = vrot.slane %v1404_v6, 1  ;;  %v1984_v29 = vrot.slane %v4120_v38, 2  ;;  %v578_v9 = vshrl.u32 %v4048_v45, 16 }
  0x36   : > { %680 = vrot.lane.b32.xlu1 %v561_v58, %s3830_s21  ;;  %v4067_v58 = vld [vmem:[%s3872_s17 + $0x30] sm:$0xff]   ;;  %v569_v61 = vsel %vm525_vm2, %v564_v52, %v568_v53  ;;  %v572_v50 = vor.u32 %v570_v47, %v568_v53  ;;  %v1413_v49 = vshrl.u32 %v3685_v63, 16  ;;  %v1416_v8 = vshll.u32 %v3685_v63, 16  ;;  %v3693_v47 = vld [vmem:[%s3872_s17 + $0x38] sm:$0xff]  }
  0x37   : > { %v2261_v52 = vrot.slane %v2259_v25, 2  ;;  %v582_v54 = vshll.u32 %v3693_v47, 16  ;;  %v3692_v63 = vld [vmem:[%s3872_s17 + $0x38] sm:$0xff]   ;;  %v580_v6 = vor.u32 %v578_v9, %v4073_v62  ;;  %v4236_v9 = vld [vmem:[%s3872_s17 + $0x50] sm:$0xff]  }
  0x38   : > { %v577_v37 = vsel %vm525_vm2, %v572_v50, %v4073_v62  ;;  %v1415_v22 = vrot.slane %v1413_v49, 1  ;;  %v1418_v23 = vrot.slane %v1416_v8, 2  ;;  %v4170_v49 = vld [vmem:[%s3872_s17 + $0x40] sm:$0xff]   ;;  %v3701_v62 = vld [vmem:[%s3872_s17 + $0x48] sm:$0xff]  }
  0x39   : > { %919 = vrot.lane.b32.xlu0 %v884_v7, %s3828_s19  ;;  %v1407_v7 = vshll.u32 %v3684_v60, 16  ;;  %v3700_v8 = vld [vmem:[%s3872_s17 + $0x40] sm:$0xff]  }
  0x3a   : > { %921 = vrot.lane.b32.xlu1 %v886_v4, %s3828_s19  ;;  %v889_v4 = vrot.slane %v4067_v58, 1  ;;  %v4112_v32 = vor.u32 %v1418_v23, %v1415_v22  ;;  %v3698_v23 = vld [vmem:[%s3872_s17 + $0x40] sm:$0xff]   ;;  %v3707_v58 = vld [vmem:[%s3872_s17 + $0x50] sm:$0xff]  }
  0x3b   : > { %v1131_v25 = vrot.slane %v3698_v23, 1  ;;  %v2286_v5 = vshrl.u32 %v3707_v58, 16  ;;  %v4265_v23 = vld [vmem:[%s3872_s17 + $0x50] sm:$0xff]  }
  0x3c   : > { %v890_v19 = vsel %vm877_vm0, %v887_v2, %v889_v4 }
  0x3d   : > { %1159 = vrot.lane.b32.xlu0 %v1124_v11, %s3827_s18  ;;  %v1409_v11 = vrot.slane %v1407_v7, 2  ;;  %v3696_v7 = vld [vmem:[%s3872_s17 + $0x38] sm:$0xff]  }
  0x3e   : > { %1161 = vrot.lane.b32.xlu1 %v1126_v12, %s3827_s18  ;;  %v1127_v12 = vrot.slane %v3682_v3, 1  ;;  %v586_v3 = vshrl.u32 %v3693_v47, 16  ;;  %v891_v22 = vrot.slane %v3696_v7, 1  ;;  %v3710_v7 = vld [vmem:[%s3872_s17 + $0x48] sm:$0xff]  }
  0x40   : > { %v1130_v28 = vsel %vm877_vm0, %v1127_v12, %v1129_v14  ;;  %v1128_v43 = vsel %vm877_vm0, %v1125_v1, %v1127_v12  ;;  %v892_v47 = vsel %vm877_vm0, %v889_v4, %v891_v22  ;;  %v1132_v4 = vsel %vm877_vm0, %v1129_v14, %v1131_v25 }
  0x41   : > { %1533 = vrot.lane.b32.xlu0 %v1393_v20, %s3831_s22  ;;  %v3691_v20 = vld [vmem:[%s3872_s17 + $0x40] sm:$0xff]  }
  0x42   : > { %1535 = vrot.lane.b32.xlu1 %v1402_v26, %s3831_s22  ;;  %v888_v26 = vsel %vm877_vm0, %v885_v55, %v887_v2  ;;  %v1742_v55 = vrot.slane %v3686_v16, 2  ;;  %v2268_v39 = vshrl.u32 %v3691_v20, 16  ;;  %v584_v2 = vrot.slane %v582_v54, 1  ;;  %v3721_v16 = vld [vmem:[%s3872_s17 + $0x10] sm:$0xff]  }
  0x43   : > { %379 = vst.msk [vmem:[#allocation2 + $0x10] sm:$0xff] %vm376_vm6, %v3721_v16 }
  0x44   : > { %v1745_v44 = vsel %vm1732_vm1, %v1742_v55, %v1744_v33  ;;  %v2270_v53 = vrot.slane %v2268_v39, 2  ;;  %v585_v12 = vsel %vm525_vm2, %v580_v6, %v584_v2  ;;  %v1988_v6 = vrot.slane %v4236_v9, 2 }
  0x45   : > { %1774 = vrot.lane.b32.xlu0 %v1739_v56, %s3829_s20  ;;  %v2262_v56 = vshll.u32 %v3690_v13, 16  ;;  %v4190_v13 = vld [vmem:[%s3872_s17 + $0x48] sm:$0xff]  }
  0x46   : > { %1776 = vrot.lane.b32.xlu1 %v1741_v30, %s3829_s20  ;;  %v1410_v30 = vor.u32 %v1409_v11, %v1406_v17 }
  0x48   : > { %v1420_v51 = vsel %vm1358_vm3, %v1410_v30, %v4112_v32  ;;  %v1411_v1 = vsel %vm1358_vm3, %v4012_v15, %v1410_v30  ;;  %v2264_v15 = vrot.slane %v2262_v56, 3  ;;  %v1431_v30 = vshrl.u32 %v3701_v62, 16  ;;  %v3728_v56 = vld [vmem:[%s5034_s1 + $0x10] ss:$0 sps:$4 sm:$0x33]  }
  0x49   : > { %2014 = vrot.lane.b32.xlu0 %v1979_v24, %s3832_s23  ;;  %v1982_v24 = vrot.slane %v3688_v35, 2 }
  0x4a   : > { %2016 = vrot.lane.b32.xlu1 %v1981_v41, %s3832_s23  ;;  %v2271_v41 = vshll.u32 %v3691_v20, 16  ;;  %v2265_v60 = vor.u32 %v2264_v15, %v2261_v52  ;;  %v1422_v20 = vshrl.u32 %v3700_v8, 16  ;;  %v1433_v42 = vrot.slane %v1431_v30, 1  ;;  %v4219_v52 = vld [vmem:[%s3872_s17 + $0x48] sm:$0xff]  }
  0x4b   : > { %v1985_v57 = vsel %vm1732_vm1, %v1982_v24, %v1984_v29  ;;  %v1983_v50 = vsel %vm1732_vm1, %v1980_v31, %v1982_v24  ;;  %v2793_v24 = vsel %vm2791_vm7, %v3728_v56, 0  ;;  %v3706_v15 = vld [vmem:[%s3872_s17 + $0x48] sm:$0xff]  }
  0x4c   : > { %v2273_v46 = vrot.slane %v2271_v41, 3  ;;  %v2266_v31 = vsel %vm2213_vm4, %v4045_v36, %v2265_v60  ;;  %v588_v36 = vor.u32 %v586_v3, %v584_v2  ;;  %v1133_v41 = vrot.slane %v4190_v13, 1  ;;  %v3709_v30 = vld [vmem:[%s3872_s17 + $0x48] sm:$0xff]  }
  0x4d   : > { %2388 = vrot.lane.b32.xlu0 %v2248_v59, %s3833_s24  ;;  %v1743_v59 = vsel %vm1732_vm1, %v1740_v18, %v1742_v55  ;;  %v4151_v18 = vld [vmem:[%s3872_s17 + $0x40] sm:$0xff]   ;;  %v3725_v55 = vld [vmem:[%s3872_s17 + $0x18] sm:$0xff]   ;;  %v2289_v3 = vshll.u32 %v3707_v58, 16 }
  0x4e   : > { %2390 = vrot.lane.b32.xlu1 %v2257_v48, %s3833_s24  ;;  %v3711_v48 = vld [vmem:[%s3872_s17 + $0x8] sm:$0xff]   ;;  %v590_v21 = vshll.u32 %v4151_v18, 16  ;;  %380 = vst.msk [vmem:[#allocation2 + $0x18] sm:$0xff] %vm376_vm6, %v3725_v55  ;;  %v594_v27 = vshrl.u32 %v4151_v18, 16  ;;  %v606_v55 = vshll.u32 %v4265_v23, 16 }
  0x4f   : > { %378 = vst.msk [vmem:[#allocation2 + $0x8] sm:$0xff] %vm376_vm6, %v3711_v48  ;;  %v3702_v48 = vld [vmem:[%s3872_s17 + $0x40] sm:$0xff]  }
  0x50   : > { %v4181_v11 = vrot.slane %v590_v21, 1  ;;  %v1746_v54 = vrot.slane %v3702_v48, 2 }
  0x51   : > { %2629 = vrot.lane.b32.xlu0 %v2594_v34, %s3834_s25  ;;  %v4158_v34 = vld [vmem:[%s3872_s17 + $0x40] sm:$0xff]  }
  0x52   : > { %682 = vrot.lane.b32.xlu1 %v569_v61, %s3830_s21  ;;  %v4147_v61 = vor.u32 %v2273_v46, %v2270_v53  ;;  %v2599_v17 = vrot.slane %v4158_v34, 3  ;;  %v1134_v53 = vsel %vm877_vm0, %v1131_v25, %v1133_v41 }
  0x54   : > { %v2275_v45 = vsel %vm2213_vm4, %v2265_v60, %v4147_v61  ;;  %v1748_v60 = vrot.slane %v4219_v52, 2  ;;  %v610_v52 = vshrl.u32 %v4265_v23, 16 }
  0x55   : > { %2631 = vrot.lane.b32.xlu0 %v2596_v10, %s3834_s25  ;;  %v3720_v10 = vld [vmem:[%s5034_s1] sm:$0xff]  }
  0x56   : > { %684 = vrot.lane.b32.xlu1 %v577_v37, %s3830_s21  ;;  %v2597_v37 = vrot.slane %v3692_v63, 3  ;;  %3541 = vmatprep.subr.bf16.mxu0 %v3720_v10  ;;  %v2280_v63 = vshll.u32 %v3706_v15, 16 }
  0x57   : > { %3542 = vmatpush3.bf16.msra.mxu0 %v3720_v10  ;;  %v2291_v10 = vrot.slane %v2289_v3, 3 }
  0x58   : > { %v2600_v35 = vsel %vm2587_vm5, %v2597_v37, %v2599_v17  ;;  %3543 = vmatprep.subr.bf16.mxu0 %v3724_v40 }
  0x59   : > { %923 = vrot.lane.b32.xlu0 %v888_v26, %s3828_s19  ;;  %v893_v26 = vrot.slane %v4170_v49, 1  ;;  %v3729_v49 = vld [vmem:[%s3872_s17 + $0x58] sm:$0xff]  }
  0x5a   : > { %925 = vrot.lane.b32.xlu1 %v890_v19, %s3828_s19  ;;  %v2598_v19 = vsel %vm2587_vm5, %v2595_v0, %v2597_v37  ;;  %v593_v0 = vsel %vm525_vm2, %v588_v36, %v4181_v11  ;;  %v2282_v37 = vrot.slane %v2280_v63, 3  ;;  %v598_v36 = vshll.u32 %v3710_v7, 16 }
  0x5b   : > { %3544 = vmatpush3.bf16.msra.mxu0 %v3724_v40  ;;  %v894_v39 = vsel %vm877_vm0, %v891_v22, %v893_v26 }
  0x5c   : > { %3611 = vmatprep.subr.msk.bf16.mxu0 %vm2791_vm7, %v3728_v56  ;;  %v600_v40 = vrot.slane %v598_v36, 1  ;;  %v2601_v56 = vrot.slane %v3709_v30, 3  ;;  %vm2736_vm7 = vcmask 293888  }
  0x5d   : > { %1163 = vrot.lane.b32.xlu0 %v1128_v43, %s3827_s18  ;;  %v1434_v43 = vshll.u32 %v3701_v62, 16  ;;  %v1747_v62 = vsel %vm1732_vm1, %v1744_v33, %v1746_v54  ;;  %v3744_v33 = vld [vmem:[%s3872_s17 + $0x28] sm:$0xff]  }
  0x5e   : > { %1165 = vrot.lane.b32.xlu1 %v1130_v28, %s3827_s18  ;;  %v1425_v28 = vshll.u32 %v3700_v8, 16  ;;  %v2288_v8 = vrot.slane %v2286_v5, 2  ;;  %382 = vst.msk [vmem:[#allocation2 + $0x28] sm:$0xff] %vm376_vm6, %v3744_v33  ;;  %v2602_v48 = vsel %vm2587_vm5, %v2599_v17, %v2601_v56 }
  0x5f   : > { %3546 = vmatpush3.bf16.msra.mxu0 %v2793_v24  ;;  %v4295_v24 = vrot.slane %v606_v55, 1  ;;  %v2298_v55 = vshll.u32 %v3729_v49, 16 }
  0x60   : > { %v4261_v22 = vor.u32 %v2291_v10, %v2288_v8 }
  0x61   : > { %1537 = vrot.lane.b32.xlu0 %v1411_v1, %s3831_s22  ;;  %v1427_v1 = vrot.slane %v1425_v28, 2 }
  0x62   : > { %1539 = vrot.lane.b32.xlu1 %v1420_v51, %s3831_s22  ;;  %v1424_v51 = vrot.slane %v1422_v20, 1 }
  0x64   : > { %v1428_v46 = vor.u32 %v1427_v1, %v1424_v51  ;;  %v4288_v51 = vld [vmem:[%s3872_s17 + $0x50] sm:$0xff]  }
  0x65   : > { %1778 = vrot.lane.b32.xlu0 %v1743_v59, %s3829_s20  ;;  %v3718_v1 = vld [vmem:[%s3872_s17 + $0x50] sm:$0xff]   ;;  %v897_v58 = vrot.slane %v4288_v51, 1 }
  0x66   : > { %1780 = vrot.lane.b32.xlu1 %v1745_v44, %s3829_s20  ;;  %v1436_v44 = vrot.slane %v1434_v43, 2  ;;  %v1429_v14 = vsel %vm1358_vm3, %v4112_v32, %v1428_v46  ;;  %v3741_v32 = vld [vmem:[%s3872_s17 + $0x20] sm:$0xff]   ;;  %v596_v43 = vor.u32 %v594_v27, %v4181_v11 }
  0x67   : > { %381 = vst.msk [vmem:[#allocation2 + $0x20] sm:$0xff] %vm376_vm6, %v3741_v32 }
  0x68   : > { %v4227_v59 = vor.u32 %v1436_v44, %v1433_v42  ;;  %v601_v42 = vsel %vm525_vm2, %v596_v43, %v600_v40  ;;  %v4358_v43 = vld [vmem:[%s3872_s17 + $0x60] sm:$0xff]  }
  0x69   : > { %2018 = vrot.lane.b32.xlu0 %v1983_v50, %s3832_s23  ;;  %v2277_v50 = vshrl.u32 %v3706_v15, 16 }
  0x6a   : > { %2020 = vrot.lane.b32.xlu1 %v1985_v57, %s3832_s23  ;;  %v3704_v57 = vld [vmem:[%s3872_s17 + $0x48] sm:$0xff]   ;;  %v1438_v2 = vsel %vm1358_vm3, %v1428_v46, %v4227_v59 }
  0x6b   : > { %v2279_v21 = vrot.slane %v2277_v50, 2 }
  0x6d   : > { %2392 = vrot.lane.b32.xlu0 %v2266_v31, %s3833_s24  ;;  %v1749_v31 = vsel %vm1732_vm1, %v1746_v54, %v1748_v60  ;;  %v1440_v54 = vshrl.u32 %v3718_v1, 16 }
  0x6e   : > { %2394 = vrot.lane.b32.xlu1 %v2275_v45, %s3833_s24  ;;  %v1986_v45 = vrot.slane %v3704_v57, 2  ;;  %v1443_v57 = vshll.u32 %v3718_v1, 16 }
  0x70   : > { %v1989_v16 = vsel %vm1732_vm1, %v1986_v45, %v1988_v6  ;;  %v1987_v28 = vsel %vm1732_vm1, %v1984_v29, %v1986_v45  ;;  %v602_v29 = vshrl.u32 %v3710_v7, 16  ;;  %v4318_v45 = vld [vmem:[%s3872_s17 + $0x50] sm:$0xff]   ;;  %v1445_v7 = vrot.slane %v1443_v57, 2 }
  0x71   : > { %2633 = vrot.lane.b32.xlu0 %v2598_v19, %s3834_s25  ;;  %v2283_v19 = vor.u32 %v2282_v37, %v2279_v21  ;;  %v1442_v21 = vrot.slane %v1440_v54, 1  ;;  %v1750_v33 = vrot.slane %v4318_v45, 2  ;;  %v4402_v45 = vld [vmem:[%s3872_s17 + $0x60] sm:$0xff]  }
  0x72   : > { %686 = vrot.lane.b32.xlu1 %v585_v12, %s3830_s21  ;;  %v604_v44 = vor.u32 %v602_v29, %v600_v40  ;;  %v2295_v29 = vshrl.u32 %v3729_v49, 16  ;;  %v3777_v49 = vld [vmem:[%s3872_s17 + $0x40] sm:$0xff]  }
  0x73   : > { %v2293_v38 = vsel %vm2213_vm4, %v2283_v19, %v4261_v22  ;;  %v2284_v25 = vsel %vm2213_vm4, %v4147_v61, %v2283_v19  ;;  %v3719_v61 = vld [vmem:[%s3872_s17 + $0x58] sm:$0xff]   ;;  %v1446_v19 = vor.u32 %v1445_v7, %v1442_v21  ;;  %385 = vst.msk [vmem:[#allocation2 + $0x40] sm:$0xff] %vm376_vm6, %v3777_v49  ;;  %v3795_v49 = vld [vmem:[%s3872_s17 + $0x50] sm:$0xff]  }
  0x74   : > { %v609_v34 = vsel %vm525_vm2, %v604_v44, %v4295_v24  ;;  %v1449_v17 = vshrl.u32 %v3719_v61, 16  ;;  %v1452_v50 = vshll.u32 %v3719_v61, 16  ;;  %v1992_v44 = vrot.slane %v4358_v43, 2  ;;  %v3732_v61 = vld [vmem:[%s3872_s17 + $0x58] sm:$0xff]   ;;  %387 = vst.msk [vmem:[#allocation2 + $0x50] sm:$0xff] %vm376_vm6, %v3795_v49  ;;  %v4534_v43 = vld [vmem:[%s3872_s17 + $0x70] sm:$0xff]  }
  0x75   : > { %2635 = vrot.lane.b32.xlu0 %v2600_v35, %s3834_s25  ;;  %v614_v57 = vshll.u32 %v3732_v61, 16  ;;  %v618_v21 = vshrl.u32 %v3732_v61, 16  ;;  %v3755_v49 = vld [vmem:[%s3872_s17 + $0x70] sm:$0xff]  }
  0x76   : > { %688 = vrot.lane.b32.xlu1 %v593_v0, %s3830_s21  ;;  %v4275_v0 = vld [vmem:[%s3872_s17 + $0x50] sm:$0xff]   ;;  %v1451_v37 = vrot.slane %v1449_v17, 1  ;;  %v1454_v8 = vrot.slane %v1452_v50, 2 }
  0x77   : > { %v2603_v11 = vrot.slane %v4275_v0, 3  ;;  %v616_v23 = vrot.slane %v614_v57, 1 }
  0x78   : > { %v4348_v27 = vor.u32 %v1454_v8, %v1451_v37 }
  0x79   : > { %927 = vrot.lane.b32.xlu0 %v892_v47, %s3828_s19 }
  0x7a   : > { %929 = vrot.lane.b32.xlu1 %v894_v39, %s3828_s19  ;;  %v3714_v39 = vld [vmem:[%s3872_s17 + $0x48] sm:$0xff]   ;;  %v1456_v13 = vsel %vm1358_vm3, %v1446_v19, %v4348_v27 }
  0x7b   : > { %v895_v15 = vrot.slane %v3714_v39, 1 }
  0x7d   : > { %1167 = vrot.lane.b32.xlu0 %v1132_v4, %s3827_s18  ;;  %v4304_v4 = vld [vmem:[%s3872_s17 + $0x58] sm:$0xff]   ;;  %v896_v32 = vsel %vm877_vm0, %v893_v26, %v895_v15 }
  0x7e   : > { %1169 = vrot.lane.b32.xlu1 %v1134_v53, %s3827_s18  ;;  %v3716_v53 = vld [vmem:[%s3872_s17 + $0x50] sm:$0xff]  }
  0x7f   : > { %v1135_v3 = vrot.slane %v3716_v53, 1 }
  0x81   : > { %1541 = vrot.lane.b32.xlu0 %v1429_v14, %s3831_s22  ;;  %v1137_v14 = vrot.slane %v4304_v4, 1  ;;  %v1136_v40 = vsel %vm877_vm0, %v1133_v41, %v1135_v3 }
  0x82   : > { %1543 = vrot.lane.b32.xlu1 %v1438_v2, %s3831_s22  ;;  %v2604_v2 = vsel %vm2587_vm5, %v2601_v56, %v2603_v11  ;;  %v1447_v56 = vsel %vm1358_vm3, %v4227_v59, %v1446_v19  ;;  %v2300_v59 = vrot.slane %v2298_v55, 3  ;;  %v3740_v19 = vld [vmem:[%s3872_s17 + $0x68] sm:$0xff]  }
  0x83   : > { %v1138_v26 = vsel %vm877_vm0, %v1135_v3, %v1137_v14 }
  0x85   : > { %1782 = vrot.lane.b32.xlu0 %v1747_v62, %s3829_s20  ;;  %v4332_v62 = vld [vmem:[%s3872_s17 + $0x58] sm:$0xff]  }
  0x86   : > { %1784 = vrot.lane.b32.xlu1 %v1749_v31, %s3829_s20  ;;  %v898_v31 = vsel %vm877_vm0, %v895_v15, %v897_v58 }
  0x87   : > { %v1156_v12 = vpop.permute.xlu0 %1155 }
  0x88   : > { %v916_v20 = vpop.permute.xlu1 %915 }
  0x89   : > { %2022 = vrot.lane.b32.xlu0 %v1987_v28, %s3832_s23  ;;  %v3762_v28 = vld [vmem:[%s3872_s17 + $0x38] sm:$0xff]  }
  0x8a   : > { %2024 = vrot.lane.b32.xlu1 %v1989_v16, %s3832_s23  ;;  %v3730_v16 = vld [vmem:[%s3872_s17 + $0x60] sm:$0xff]   ;;  %384 = vst.msk [vmem:[#allocation2 + $0x38] sm:$0xff] %vm376_vm6, %v3762_v28  ;;  %v2607_v28 = vrot.slane %v4402_v45, 3 }
  0x8b   : > { %v4278_v18 = vpop.permute.xlu0 %1770  ;;  %v2304_v41 = vshrl.u32 %v3730_v16, 16 }
  0x8c   : > { %v918_v35 = vpop.permute.xlu1 %917 }
  0x8d   : > { %2396 = vrot.lane.b32.xlu0 %v2284_v25, %s3833_s24 }
  0x8e   : > { %2398 = vrot.lane.b32.xlu1 %v2293_v38, %s3833_s24  ;;  %v1752_v38 = vrot.slane %v4332_v62, 2 }
  0x8f   : > { %v675_v46 = vpop.permute.xlu0 %674 }
  0x90   : > { %v1158_v47 = vpop.permute.xlu1 %1157  ;;  %729 = vst.msk [vmem:[#allocation2] sm:$0xff] %vm728_vm8, %v675_v46  ;;  %v1751_v46 = vsel %vm1732_vm1, %v1748_v60, %v1750_v33  ;;  %v4392_v60 = vld [vmem:[%s3872_s17 + $0x60] sm:$0xff]  }
  0x91   : > { %970 = vst.msk [vmem:[#allocation2] sm:$0xff] %vm969_vm9, %v916_v20  ;;  %2637 = vrot.lane.b32.xlu0 %v2602_v48, %s3834_s25  ;;  %v3726_v20 = vld [vmem:[%s3872_s17 + $0x58] sm:$0xff]   ;;  %v2306_v48 = vrot.slane %v2304_v41, 2  ;;  %v622_v7 = vshll.u32 %v4392_v60, 16  ;;  %v3780_v41 = vld [vmem:[%s3872_s17 + $0x48] sm:$0xff]  }
  0x92   : > { %690 = vrot.lane.b32.xlu1 %v601_v42, %s3830_s21  ;;  %1210 = vst.msk [vmem:[#allocation2] sm:$0xff] %vm1209_vm10, %v1156_v12  ;;  %v3759_v12 = vld [vmem:[%s3872_s17 + $0x30] sm:$0xff]   ;;  %v1990_v1 = vrot.slane %v3726_v20, 2  ;;  %v1753_v42 = vsel %vm1732_vm1, %v1750_v33, %v1752_v38 }
  0x93   : > { %v677_v5 = vpop.permute.xlu0 %676  ;;  %383 = vst.msk [vmem:[#allocation2 + $0x30] sm:$0xff] %vm376_vm6, %v3759_v12  ;;  %386 = vst.msk [vmem:[#allocation2 + $0x48] sm:$0xff] %vm376_vm6, %v3780_v41 }
  0x94   : > { %v1773_v63 = vpop.permute.xlu1 %1772  ;;  %730 = vst.msk [vmem:[#allocation2 + $0x8] sm:$0xff] %vm728_vm8, %v677_v5  ;;  %v3731_v5 = vld [vmem:[%s3872_s17 + $0x58] sm:$0xff]  }
  0x95   : > { %971 = vst.msk [vmem:[#allocation2 + $0x8] sm:$0xff] %vm969_vm9, %v918_v35  ;;  %2639 = vrot.lane.b32.xlu0 %v2604_v2, %s3834_s25  ;;  %v2307_v35 = vshll.u32 %v3730_v16, 16  ;;  %v1991_v2 = vsel %vm1732_vm1, %v1988_v6, %v1990_v1  ;;  %v612_v6 = vor.u32 %v610_v52, %v4295_v24  ;;  %v3739_v24 = vld [vmem:[%s3872_s17 + $0x60] sm:$0xff]   ;;  %v620_v16 = vor.u32 %v618_v21, %v616_v23  ;;  %v4464_v52 = vld [vmem:[%s3872_s17 + $0x68] sm:$0xff]  }
  0x96   : > { %692 = vrot.lane.b32.xlu1 %v609_v34, %s3830_s21  ;;  %1211 = vst.msk [vmem:[#allocation2 + $0x8] sm:$0xff] %vm1209_vm10, %v1158_v47  ;;  %v2297_v47 = vrot.slane %v2295_v29, 2  ;;  %v1993_v34 = vsel %vm1732_vm1, %v1990_v1, %v1992_v44  ;;  %v1458_v0 = vshrl.u32 %v3739_v24, 16 }
  0x97   : > { %v1530_v36 = vpop.permute.xlu0 %1529  ;;  %v2309_v15 = vrot.slane %v2307_v35, 3 }
  0x98   : > { %v1532_v10 = vpop.permute.xlu1 %1531  ;;  %1584 = vst.msk [vmem:[#allocation2] sm:$0xff] %vm1583_vm11, %v1530_v36  ;;  %v2301_v17 = vor.u32 %v2300_v59, %v2297_v47 }
  0x99   : > { %1585 = vst.msk [vmem:[#allocation2 + $0x8] sm:$0xff] %vm1583_vm11, %v1532_v10  ;;  %931 = vrot.lane.b32.xlu0 %v896_v32, %s3828_s19  ;;  %v4388_v50 = vor.u32 %v2309_v15, %v2306_v48  ;;  %v2605_v10 = vrot.slane %v3731_v5, 3  ;;  %v4413_v32 = vld [vmem:[%s3872_s17 + $0x60] sm:$0xff]   ;;  %v1460_v48 = vrot.slane %v1458_v0, 1  ;;  %v3748_v5 = vld [vmem:[%s3872_s17 + $0x70] sm:$0xff]  }
  0x9a   : > { %933 = vrot.lane.b32.xlu1 %v898_v31, %s3828_s19  ;;  %1826 = vst.msk [vmem:[#allocation2 + $0x8] sm:$0xff] %vm1824_vm12, %v1773_v63  ;;  %1825 = vst.msk [vmem:[#allocation2] sm:$0xff] %vm1824_vm12, %v4278_v18  ;;  %v3735_v31 = vld [vmem:[%s3872_s17 + $0x58] sm:$0xff]   ;;  %v2302_v8 = vsel %vm2213_vm4, %v4261_v22, %v2301_v17  ;;  %v617_v22 = vsel %vm525_vm2, %v612_v6, %v616_v23  ;;  %v4506_v0 = vld [vmem:[%s3872_s17 + $0x70] sm:$0xff]  }
  0x9b   : > { %v2011_v18 = vpop.permute.xlu0 %2010  ;;  %v2311_v9 = vsel %vm2213_vm4, %v2301_v17, %v4388_v50  ;;  %v2606_v20 = vsel %vm2587_vm5, %v2603_v11, %v2605_v10  ;;  %v899_v55 = vrot.slane %v3735_v31, 1  ;;  %v1461_v11 = vshll.u32 %v3739_v24, 16  ;;  %v3742_v17 = vld [vmem:[%s3872_s17 + $0x60] sm:$0xff]  }
  0x9c   : > { %v2013_v30 = vpop.permute.xlu1 %2012  ;;  %2065 = vst.msk [vmem:[#allocation2] sm:$0xff] %vm2064_vm13, %v2011_v18  ;;  %v2608_v1 = vsel %vm2587_vm5, %v2605_v10, %v2607_v28  ;;  %v1754_v6 = vrot.slane %v3742_v17, 2  ;;  %v2325_v10 = vshll.u32 %v3748_v5, 16 }
  0x9d   : > { %2066 = vst.msk [vmem:[#allocation2 + $0x8] sm:$0xff] %vm2064_vm13, %v2013_v30  ;;  %1171 = vrot.lane.b32.xlu0 %v1136_v40, %s3827_s18  ;;  %v3737_v30 = vld [vmem:[%s3872_s17 + $0x60] sm:$0xff]   ;;  %v4433_v40 = vld [vmem:[%s3872_s17 + $0x68] sm:$0xff]   ;;  %v1463_v15 = vrot.slane %v1461_v11, 2  ;;  %v900_v57 = vsel %vm877_vm0, %v897_v58, %v899_v55  ;;  %v626_v11 = vshrl.u32 %v4392_v60, 16  ;;  %v4523_v60 = vld [vmem:[%s3872_s17 + $0x70] sm:$0xff]  }
  0x9e   : > { %1173 = vrot.lane.b32.xlu1 %v1138_v26, %s3827_s18  ;;  %v4423_v26 = vrot.slane %v622_v7, 1  ;;  %v1139_v47 = vrot.slane %v3737_v30, 1  ;;  %v1141_v59 = vrot.slane %v4433_v40, 1  ;;  %v4482_v7 = vld [vmem:[%s3872_s17 + $0x70] sm:$0xff]  }
  0x9f   : > { %v2385_v39 = vpop.permute.xlu0 %2384  ;;  %v1464_v58 = vor.u32 %v1463_v15, %v1460_v48  ;;  %v4529_v48 = vld [vmem:[%s3872_s17 + $0x68] sm:$0xff]  }
  0xa0   : > { %v2387_v25 = vpop.permute.xlu1 %2386  ;;  %2439 = vst.msk [vmem:[#allocation2] sm:$0xff] %vm2438_vm14, %v2385_v39  ;;  %v625_v35 = vsel %vm525_vm2, %v620_v16, %v4423_v26  ;;  %v1142_v51 = vsel %vm877_vm0, %v1139_v47, %v1141_v59  ;;  %v1140_v23 = vsel %vm877_vm0, %v1137_v14, %v1139_v47  ;;  %v1756_v14 = vrot.slane %v4464_v52, 2 }
  0xa1   : > { %2440 = vst.msk [vmem:[#allocation2 + $0x8] sm:$0xff] %vm2438_vm14, %v2387_v25  ;;  %1545 = vrot.lane.b32.xlu0 %v1447_v56, %s3831_s22  ;;  %v1467_v25 = vshrl.u32 %v3740_v19, 16  ;;  %v1470_v56 = vshll.u32 %v3740_v19, 16  ;;  %v1996_v16 = vrot.slane %v4482_v7, 2  ;;  %v638_v47 = vshll.u32 %v4506_v0, 16 }
  0xa2   : > { %1547 = vrot.lane.b32.xlu1 %v1456_v13, %s3831_s22  ;;  %v901_v13 = vrot.slane %v4413_v32, 1 }
  0xa3   : > { %v2626_v54 = vpop.permute.xlu0 %2625 }
  0xa4   : > { %v679_v53 = vpop.permute.xlu1 %678  ;;  %2680 = vst.msk [vmem:[#allocation2] sm:$0xff] %vm2679_vm15, %v2626_v54  ;;  %v902_v61 = vsel %vm877_vm0, %v899_v55, %v901_v13  ;;  %v1755_v55 = vsel %vm1732_vm1, %v1752_v38, %v1754_v6 }
  0xa5   : > { %731 = vst.msk [vmem:[#allocation2 + $0x10] sm:$0xff] %vm728_vm8, %v679_v53  ;;  %1786 = vrot.lane.b32.xlu0 %v1751_v46, %s3829_s20  ;;  %v1469_v53 = vrot.slane %v1467_v25, 1  ;;  %v1472_v46 = vrot.slane %v1470_v56, 2 }
  0xa6   : > { %1788 = vrot.lane.b32.xlu1 %v1753_v42, %s3829_s20 }
  0xa7   : > { %v2628_v3 = vpop.permute.xlu0 %2627 }
  0xa8   : > { %v681_v63 = vpop.permute.xlu1 %680  ;;  %2681 = vst.msk [vmem:[#allocation2 + $0x8] sm:$0xff] %vm2679_vm15, %v2628_v3 }
  0xa9   : > { %732 = vst.msk [vmem:[#allocation2 + $0x18] sm:$0xff] %vm728_vm8, %v681_v63  ;;  %2026 = vrot.lane.b32.xlu0 %v1991_v2, %s3832_s23  ;;  %v3747_v63 = vld [vmem:[%s3872_s17 + $0x68] sm:$0xff]   ;;  %v4471_v2 = vor.u32 %v1472_v46, %v1469_v53  ;;  %v628_v53 = vor.u32 %v626_v11, %v4423_v26 }
  0xaa   : > { %2028 = vrot.lane.b32.xlu1 %v1993_v34, %s3832_s23  ;;  %v2313_v31 = vshrl.u32 %v3747_v63, 16  ;;  %v3806_v26 = vld [vmem:[%s3872_s17 + $0x68] sm:$0xff]  }
  0xab   : > { %v920_v12 = vpop.permute.xlu0 %919  ;;  %v2698_v36 = vld [vmem:[#allocation2] sm:$0xff]  ;;  %v1474_v4 = vsel %vm1358_vm3, %v1464_v58, %v4471_v2  ;;  %390 = vst.msk [vmem:[#allocation2 + $0x68] sm:$0xff] %vm376_vm6, %v3806_v26 }
  0xac   : > { %v922_v37 = vpop.permute.xlu1 %921  ;;  %972 = vst.msk [vmem:[#allocation2 + $0x10] sm:$0xff] %vm969_vm9, %v920_v12  ;;  %3547 = vmatprep.mubr.msk.bf16.mxu0 %vm2736_vm7, %v2698_v36  ;;  %v1465_v36 = vsel %vm1358_vm3, %v4348_v27, %v1464_v58  ;;  %v2315_v19 = vrot.slane %v2313_v31, 2  ;;  %v1757_v27 = vsel %vm1732_vm1, %v1754_v6, %v1756_v14 }
  0xad   : > { %973 = vst.msk [vmem:[#allocation2 + $0x18] sm:$0xff] %vm969_vm9, %v922_v37  ;;  %2400 = vrot.lane.b32.xlu0 %v2302_v8, %s3833_s24  ;;  %v2316_v37 = vshll.u32 %v3747_v63, 16  ;;  %v2322_v8 = vshrl.u32 %v3748_v5, 16 }
  0xae   : > { %2402 = vrot.lane.b32.xlu1 %v2311_v9, %s3833_s24  ;;  %v3745_v9 = vld [vmem:[%s3872_s17 + $0x68] sm:$0xff]  }
  0xaf   : > { %v1160_v18 = vpop.permute.xlu0 %1159  ;;  %v2699_v29 = vld [vmem:[#allocation2 + $0x8] sm:$0xff]  ;;  %v2324_v30 = vrot.slane %v2322_v8, 2 }
  0xb0   : > { %v1162_v33 = vpop.permute.xlu1 %1161  ;;  %1212 = vst.msk [vmem:[#allocation2 + $0x10] sm:$0xff] %vm1209_vm10, %v1160_v18  ;;  %3548 = vmatmul.mubr.msk.bf16.vlgmr.msra.gmra.mrb[0].mxu0 %vm2736_vm7, %v2699_v29  ;;  %v2327_v18 = vrot.slane %v2325_v10, 3 }
  0xb1   : > { %1213 = vst.msk [vmem:[#allocation2 + $0x18] sm:$0xff] %vm1209_vm10, %v1162_v33  ;;  %2641 = vrot.lane.b32.xlu0 %v2606_v20, %s3834_s25  ;;  %v2318_v33 = vrot.slane %v2316_v37, 3  ;;  %v3750_v20 = vld [vmem:[%s3872_s17 + $0x68] sm:$0xff]  }
  0xb2   : > { %694 = vrot.lane.b32.xlu1 %v617_v22, %s3830_s21  ;;  %v1994_v22 = vrot.slane %v3745_v9, 2  ;;  %v4516_v25 = vor.u32 %v2327_v18, %v2324_v30  ;;  %v630_v56 = vshll.u32 %v3750_v20, 16 }
  0xb3   : > { %v1534_v42 = vpop.permute.xlu0 %1533  ;;  %v2319_v38 = vor.u32 %v2318_v33, %v2315_v19 }
  0xb4   : > { %v1536_v39 = vpop.permute.xlu1 %1535  ;;  %1586 = vst.msk [vmem:[#allocation2 + $0x10] sm:$0xff] %vm1583_vm11, %v1534_v42  ;;  %v1997_v62 = vsel %vm1732_vm1, %v1994_v22, %v1996_v16  ;;  %v3749_v42 = vld [vmem:[%s3872_s17 + $0x68] sm:$0xff]   ;;  %v632_v46 = vrot.slane %v630_v56, 1 }
  0xb5   : > { %1587 = vst.msk [vmem:[#allocation2 + $0x18] sm:$0xff] %vm1583_vm11, %v1536_v39  ;;  %2643 = vrot.lane.b32.xlu0 %v2608_v1, %s3834_s25  ;;  %v1995_v1 = vsel %vm1732_vm1, %v1992_v44, %v1994_v22  ;;  %v3757_v44 = vld [vmem:[%s3872_s17 + $0x70] sm:$0xff]   ;;  %v2329_v15 = vsel %vm2213_vm4, %v2319_v38, %v4516_v25  ;;  %v2320_v63 = vsel %vm2213_vm4, %v4388_v50, %v2319_v38  ;;  %v905_v50 = vrot.slane %v4534_v43, 1 }
  0xb6   : > { %696 = vrot.lane.b32.xlu1 %v625_v35, %s3830_s21  ;;  %v3798_v35 = vld [vmem:[%s3872_s17 + $0x58] sm:$0xff]   ;;  %v1476_v9 = vshrl.u32 %v3757_v44, 16  ;;  %v633_v6 = vsel %vm525_vm2, %v628_v53, %v632_v46  ;;  %v1479_v37 = vshll.u32 %v3757_v44, 16 }
  0xb7   : > { %v1775_v34 = vpop.permute.xlu0 %1774  ;;  %388 = vst.msk [vmem:[#allocation2 + $0x58] sm:$0xff] %vm376_vm6, %v3798_v35 }
  0xb8   : > { %v1777_v54 = vpop.permute.xlu1 %1776  ;;  %1827 = vst.msk [vmem:[#allocation2 + $0x10] sm:$0xff] %vm1824_vm12, %v1775_v34  ;;  %v3805_v34 = vld [vmem:[%s3872_s17 + $0x60] sm:$0xff]  }
  0xb9   : > { %1828 = vst.msk [vmem:[#allocation2 + $0x18] sm:$0xff] %vm1824_vm12, %v1777_v54  ;;  %935 = vrot.lane.b32.xlu0 %v900_v57, %s3828_s19  ;;  %v634_v54 = vshrl.u32 %v3750_v20, 16  ;;  %v3758_v57 = vld [vmem:[%s3872_s17 + $0x78] sm:$0xff]   ;;  %v1478_v20 = vrot.slane %v1476_v9, 1 }
  0xba   : > { %937 = vrot.lane.b32.xlu1 %v902_v61, %s3828_s19  ;;  %389 = vst.msk [vmem:[#allocation2 + $0x60] sm:$0xff] %vm376_vm6, %v3805_v34  ;;  %v1488_v22 = vshll.u32 %v3758_v57, 16 }
  0xbb   : > { %v2015_v21 = vpop.permute.xlu0 %2014  ;;  %v636_v31 = vor.u32 %v634_v54, %v632_v46  ;;  %v3763_v46 = vld [vmem:[%s3872_s17 + $0x78] sm:$0xff]   ;;  %v4613_v54 = vld [vmem:[%s3872_s17 + $0x80] sm:$0xff]  }
  0xbc   : > { %v2017_v3 = vpop.permute.xlu1 %2016  ;;  %2067 = vst.msk [vmem:[#allocation2 + $0x10] sm:$0xff] %vm2064_vm13, %v2015_v21  ;;  %v903_v21 = vrot.slane %v4529_v48, 1  ;;  %v1490_v18 = vrot.slane %v1488_v22, 2  ;;  %v4643_v22 = vld [vmem:[%s3872_s17 + $0x80] sm:$0xff]  }
  0xbd   : > { %2068 = vst.msk [vmem:[#allocation2 + $0x18] sm:$0xff] %vm2064_vm13, %v2017_v3  ;;  %1175 = vrot.lane.b32.xlu0 %v1140_v23, %s3827_s18  ;;  %v2611_v3 = vrot.slane %v4523_v60, 3  ;;  %v4547_v23 = vrot.slane %v638_v47, 1 }
  0xbe   : > { %1177 = vrot.lane.b32.xlu1 %v1142_v51, %s3827_s18  ;;  %v2609_v51 = vrot.slane %v3749_v42, 3  ;;  %v904_v35 = vsel %vm877_vm0, %v901_v13, %v903_v21  ;;  %v3765_v13 = vld [vmem:[%s3872_s17 + $0x78] sm:$0xff]   ;;  %v3766_v42 = vld [vmem:[%s3872_s17 + $0x80] sm:$0xff]  }
  0xbf   : > { %v2389_v24 = vpop.permute.xlu0 %2388  ;;  %v641_v45 = vsel %vm525_vm2, %v636_v31, %v4547_v23  ;;  %v2331_v40 = vshrl.u32 %v3765_v13, 16  ;;  %v2343_v34 = vshll.u32 %v3766_v42, 16  ;;  %v3768_v31 = vld [vmem:[%s3872_s17 + $0x78] sm:$0xff]  }
  0xc0   : > { %v2391_v12 = vpop.permute.xlu1 %2390  ;;  %2441 = vst.msk [vmem:[#allocation2 + $0x10] sm:$0xff] %vm2438_vm14, %v2389_v24  ;;  %v2610_v10 = vsel %vm2587_vm5, %v2607_v28, %v2609_v51  ;;  %v4565_v24 = vld [vmem:[%s3872_s17 + $0x78] sm:$0xff]   ;;  %v2612_v19 = vsel %vm2587_vm5, %v2609_v51, %v2611_v3 }
  0xc1   : > { %2442 = vst.msk [vmem:[#allocation2 + $0x18] sm:$0xff] %vm2438_vm14, %v2391_v12  ;;  %1549 = vrot.lane.b32.xlu0 %v1465_v36, %s3831_s22  ;;  %v2333_v26 = vrot.slane %v2331_v40, 2 }
  0xc2   : > { %1551 = vrot.lane.b32.xlu1 %v1474_v4, %s3831_s22  ;;  %v1485_v4 = vshrl.u32 %v3758_v57, 16  ;;  %v2340_v57 = vshrl.u32 %v3766_v42, 16  ;;  %v4676_v42 = vld [vmem:[%s3872_s17 + $0x80] sm:$0xff]  }
  0xc3   : > { %v2630_v41 = vpop.permute.xlu0 %2629 }
  0xc4   : > { %v683_v29 = vpop.permute.xlu1 %682  ;;  %2682 = vst.msk [vmem:[#allocation2 + $0x10] sm:$0xff] %vm2679_vm15, %v2630_v41  ;;  %v1487_v30 = vrot.slane %v1485_v4, 1  ;;  %v1145_v41 = vrot.slane %v4565_v24, 1 }
  0xc5   : > { %733 = vst.msk [vmem:[#allocation2 + $0x20] sm:$0xff] %vm728_vm8, %v683_v29  ;;  %1790 = vrot.lane.b32.xlu0 %v1755_v55, %s3829_s20  ;;  %v906_v29 = vsel %vm877_vm0, %v903_v21, %v905_v50  ;;  %v1143_v55 = vrot.slane %v3755_v49, 1  ;;  %v2000_v21 = vrot.slane %v4613_v54, 2  ;;  %v646_v49 = vshll.u32 %v3768_v31, 16 }
  0xc6   : > { %1792 = vrot.lane.b32.xlu1 %v1757_v27, %s3829_s20  ;;  %v1481_v27 = vrot.slane %v1479_v37, 2  ;;  %v4590_v56 = vor.u32 %v1490_v18, %v1487_v30  ;;  %v654_v30 = vshll.u32 %v4643_v22, 16 }
  0xc7   : > { %v2632_v61 = vpop.permute.xlu0 %2631  ;;  %v1146_v32 = vsel %vm877_vm0, %v1143_v55, %v1145_v41  ;;  %v1144_v47 = vsel %vm877_vm0, %v1141_v59, %v1143_v55  ;;  %v2334_v59 = vshll.u32 %v3765_v13, 16  ;;  %v4662_v55 = vld [vmem:[%s3872_s17 + $0x80] sm:$0xff]   ;;  %v3771_v13 = vld [vmem:[%s3872_s17 + $0x78] sm:$0xff]  }
  0xc8   : > { %v685_v39 = vpop.permute.xlu1 %684  ;;  %2683 = vst.msk [vmem:[#allocation2 + $0x18] sm:$0xff] %vm2679_vm15, %v2632_v61  ;;  %v1482_v38 = vor.u32 %v1481_v27, %v1478_v20  ;;  %v650_v27 = vshrl.u32 %v3768_v31, 16 }
  0xc9   : > { %734 = vst.msk [vmem:[#allocation2 + $0x28] sm:$0xff] %vm728_vm8, %v685_v39  ;;  %2030 = vrot.lane.b32.xlu0 %v1995_v1, %s3832_s23  ;;  %v3760_v39 = vld [vmem:[%s3872_s17 + $0x70] sm:$0xff]   ;;  %v4594_v1 = vld [vmem:[%s3872_s17 + $0x78] sm:$0xff]   ;;  %v2336_v9 = vrot.slane %v2334_v59, 3 }
  0xca   : > { %2032 = vrot.lane.b32.xlu1 %v1997_v62, %s3832_s23  ;;  %v1492_v44 = vsel %vm1358_vm3, %v1482_v38, %v4590_v56  ;;  %v1760_v53 = vrot.slane %v4594_v1, 2 }
  0xcb   : > { %v924_v58 = vpop.permute.xlu0 %923  ;;  %v2700_v5 = vld [vmem:[#allocation2 + $0x10] sm:$0xff] }
  0xcc   : > { %v926_v17 = vpop.permute.xlu1 %925  ;;  %974 = vst.msk [vmem:[#allocation2 + $0x20] sm:$0xff] %vm969_vm9, %v924_v58  ;;  %3551 = vmatprep.mubr.msk.bf16.mxu0 %vm2736_vm7, %v2700_v5  ;;  %v1998_v5 = vrot.slane %v3763_v46, 2 }
  0xcd   : > { %975 = vst.msk [vmem:[#allocation2 + $0x28] sm:$0xff] %vm969_vm9, %v926_v17  ;;  %2404 = vrot.lane.b32.xlu0 %v2320_v63, %s3833_s24  ;;  %v1483_v63 = vsel %vm1358_vm3, %v4471_v2, %v1482_v38  ;;  %v2342_v2 = vrot.slane %v2340_v57, 2  ;;  %v3776_v38 = vld [vmem:[%s3872_s17 + $0x88] sm:$0xff]   ;;  %v907_v57 = vrot.slane %v3771_v13, 1 }
  0xce   : > { %2406 = vrot.lane.b32.xlu1 %v2329_v15, %s3833_s24  ;;  %v1758_v15 = vrot.slane %v3760_v39, 2  ;;  %v2001_v52 = vsel %vm1732_vm1, %v1998_v5, %v2000_v21  ;;  %v1503_v59 = vshrl.u32 %v3776_v38, 16  ;;  %v1506_v60 = vshll.u32 %v3776_v38, 16 }
  0xcf   : > { %v1164_v12 = vpop.permute.xlu0 %1163  ;;  %v2701_v36 = vld [vmem:[#allocation2 + $0x18] sm:$0xff] }
  0xd0   : > { %v1166_v8 = vpop.permute.xlu1 %1165  ;;  %1214 = vst.msk [vmem:[#allocation2 + $0x20] sm:$0xff] %vm1209_vm10, %v1164_v12  ;;  %3552 = vmatmul.mubr.msk.bf16.gmra.mrb[4].mxu0 %vm2736_vm7, %v2701_v36  ;;  %v1761_v58 = vsel %vm1732_vm1, %v1758_v15, %v1760_v53  ;;  %v1759_v4 = vsel %vm1732_vm1, %v1756_v14, %v1758_v15  ;;  %v642_v12 = vshrl.u32 %v4506_v0, 16  ;;  %v2337_v14 = vor.u32 %v2336_v9, %v2333_v26  ;;  %v3767_v0 = vld [vmem:[%s3872_s17 + $0x78] sm:$0xff]  }
  0xd1   : > { %1215 = vst.msk [vmem:[#allocation2 + $0x28] sm:$0xff] %vm1209_vm10, %v1166_v8  ;;  %2645 = vrot.lane.b32.xlu0 %v2610_v10, %s3834_s25  ;;  %v3807_v8 = vld [vmem:[%s3872_s17 + $0x70] sm:$0xff]  }
  0xd2   : > { %698 = vrot.lane.b32.xlu1 %v633_v6, %s3830_s21  ;;  %v2345_v6 = vrot.slane %v2343_v34, 3  ;;  %391 = vst.msk [vmem:[#allocation2 + $0x70] sm:$0xff] %vm376_vm6, %v3807_v8  ;;  %v644_v20 = vor.u32 %v642_v12, %v4547_v23  ;;  %v2613_v23 = vrot.slane %v3767_v0, 3  ;;  %v909_v34 = vrot.slane %v4676_v42, 1 }
  0xd3   : > { %v1538_v33 = vpop.permute.xlu0 %1537 }
  0xd4   : > { %v1540_v28 = vpop.permute.xlu1 %1539  ;;  %1588 = vst.msk [vmem:[#allocation2 + $0x20] sm:$0xff] %vm1583_vm11, %v1538_v33  ;;  %v4640_v36 = vor.u32 %v2345_v6, %v2342_v2  ;;  %v1505_v2 = vrot.slane %v1503_v59, 1  ;;  %v1508_v6 = vrot.slane %v1506_v60, 2  ;;  %v910_v31 = vsel %vm877_vm0, %v907_v57, %v909_v34  ;;  %v4756_v59 = vld [vmem:[%s3872_s17 + $0x90] sm:$0xff]  }
  0xd5   : > { %1589 = vst.msk [vmem:[#allocation2 + $0x28] sm:$0xff] %vm1583_vm11, %v1540_v28  ;;  %2647 = vrot.lane.b32.xlu0 %v2612_v19, %s3834_s25  ;;  %v1999_v28 = vsel %vm1732_vm1, %v1996_v16, %v1998_v5  ;;  %v3808_v19 = vld [vmem:[%s3872_s17 + $0x78] sm:$0xff]   ;;  %v648_v16 = vrot.slane %v646_v49, 1  ;;  %v3778_v49 = vld [vmem:[%s3872_s17 + $0x80] sm:$0xff]  }
  0xd6   : > { %700 = vrot.lane.b32.xlu1 %v641_v45, %s3830_s21  ;;  %392 = vst.msk [vmem:[#allocation2 + $0x78] sm:$0xff] %vm376_vm6, %v3808_v19  ;;  %v2347_v7 = vsel %vm2213_vm4, %v2337_v14, %v4640_v36 }
  0xd7   : > { %v1779_v62 = vpop.permute.xlu0 %1778  ;;  %v652_v39 = vor.u32 %v650_v27, %v648_v16  ;;  %v3781_v27 = vld [vmem:[%s3872_s17 + $0x88] sm:$0xff]  }
  0xd8   : > { %v1781_v11 = vpop.permute.xlu1 %1780  ;;  %1829 = vst.msk [vmem:[#allocation2 + $0x20] sm:$0xff] %vm1824_vm12, %v1779_v62  ;;  %v3775_v62 = vld [vmem:[%s3872_s17 + $0x80] sm:$0xff]   ;;  %v2002_v38 = vrot.slane %v3781_v27, 2 }
  0xd9   : > { %1830 = vst.msk [vmem:[#allocation2 + $0x28] sm:$0xff] %vm1824_vm12, %v1781_v11  ;;  %939 = vrot.lane.b32.xlu0 %v904_v35, %s3828_s19  ;;  %v1494_v46 = vshrl.u32 %v3775_v62, 16  ;;  %v1497_v40 = vshll.u32 %v3775_v62, 16 }
  0xda   : > { %941 = vrot.lane.b32.xlu1 %v906_v29, %s3828_s19  ;;  %v2338_v29 = vsel %vm2213_vm4, %v4516_v25, %v2337_v14  ;;  %v649_v25 = vsel %vm525_vm2, %v644_v20, %v648_v16  ;;  %v4711_v14 = vor.u32 %v1508_v6, %v1505_v2  ;;  %v2619_v2 = vrot.slane %v4756_v59, 3 }
  0xdb   : > { %v2019_v48 = vpop.permute.xlu0 %2018  ;;  %v1496_v26 = vrot.slane %v1494_v46, 1  ;;  %v1499_v9 = vrot.slane %v1497_v40, 2  ;;  %v3785_v40 = vld [vmem:[%s3872_s17 + $0x88] sm:$0xff]  }
  0xdc   : > { %v2021_v61 = vpop.permute.xlu1 %2020  ;;  %2069 = vst.msk [vmem:[#allocation2 + $0x20] sm:$0xff] %vm2064_vm13, %v2019_v48  ;;  %v2615_v48 = vrot.slane %v4662_v55, 3 }
  0xdd   : > { %2070 = vst.msk [vmem:[#allocation2 + $0x28] sm:$0xff] %vm2064_vm13, %v2021_v61  ;;  %1179 = vrot.lane.b32.xlu0 %v1144_v47, %s3827_s18  ;;  %v2614_v47 = vsel %vm2587_vm5, %v2611_v3, %v2613_v23 }
  0xde   : > { %1181 = vrot.lane.b32.xlu1 %v1146_v32, %s3827_s18  ;;  %v4672_v32 = vrot.slane %v654_v30, 1  ;;  %v4734_v30 = vld [vmem:[%s3872_s17 + $0x90] sm:$0xff]  }
  0xdf   : > { %v2393_v51 = vpop.permute.xlu0 %2392 }
  0xe0   : > { %v2395_v17 = vpop.permute.xlu1 %2394  ;;  %2443 = vst.msk [vmem:[#allocation2 + $0x20] sm:$0xff] %vm2438_vm14, %v2393_v51  ;;  %v657_v3 = vsel %vm525_vm2, %v652_v39, %v4672_v32 }
  0xe1   : > { %2444 = vst.msk [vmem:[#allocation2 + $0x28] sm:$0xff] %vm2438_vm14, %v2395_v17  ;;  %1553 = vrot.lane.b32.xlu0 %v1483_v63, %s3831_s22  ;;  %v3773_v17 = vld [vmem:[%s3872_s17 + $0x80] sm:$0xff]   ;;  %v4692_v63 = vld [vmem:[%s3872_s17 + $0x88] sm:$0xff]  }
  0xe2   : > { %1555 = vrot.lane.b32.xlu1 %v1492_v44, %s3831_s22 }
  0xe3   : > { %v2634_v10 = vpop.permute.xlu0 %2633 }
  0xe4   : > { %v687_v37 = vpop.permute.xlu1 %686  ;;  %2684 = vst.msk [vmem:[#allocation2 + $0x20] sm:$0xff] %vm2679_vm15, %v2634_v10  ;;  %v908_v10 = vsel %vm877_vm0, %v905_v50, %v907_v57  ;;  %v3783_v50 = vld [vmem:[%s3872_s17 + $0x88] sm:$0xff]   ;;  %v3788_v57 = vld [vmem:[%s3872_s17 + $0x90] ss:$0 sps:$4 sm:$0x11]  }
  0xe5   : > { %735 = vst.msk [vmem:[#allocation2 + $0x30] sm:$0xff] %vm728_vm8, %v687_v37  ;;  %1794 = vrot.lane.b32.xlu0 %v1759_v4, %s3829_s20  ;;  %v1147_v37 = vrot.slane %v3773_v17, 1  ;;  %v1149_v4 = vrot.slane %v4692_v63, 1  ;;  %v2349_v24 = vshrl.u32 %v3783_v50, 16  ;;  %v3809_v17 = vld [vmem:[%s3872_s17 + $0x80] sm:$0xff]  }
  0xe6   : > { %1796 = vrot.lane.b32.xlu1 %v1761_v58, %s3829_s20  ;;  %v2616_v58 = vsel %vm2587_vm5, %v2613_v23, %v2615_v48  ;;  %393 = vst.msk [vmem:[#allocation2 + $0x80] sm:$0xff] %vm376_vm6, %v3809_v17 }
  0xe7   : > { %v2636_v33 = vpop.permute.xlu0 %2635  ;;  %v1150_v43 = vsel %vm877_vm0, %v1147_v37, %v1149_v4  ;;  %v1148_v19 = vsel %vm877_vm0, %v1145_v41, %v1147_v37  ;;  %v2352_v41 = vshll.u32 %v3783_v50, 16  ;;  %v2351_v39 = vrot.slane %v2349_v24, 2  ;;  %v3793_v50 = vld [vmem:[%s3872_s17 + $0x90] sm:$0xff]  }
  0xe8   : > { %v689_v45 = vpop.permute.xlu1 %688  ;;  %2685 = vst.msk [vmem:[#allocation2 + $0x28] sm:$0xff] %vm2679_vm15, %v2636_v33  ;;  %v3791_v24 = vld [vmem:[%s3872_s17 + $0x90] sm:$0xff]  }
  0xe9   : > { %736 = vst.msk [vmem:[#allocation2 + $0x38] sm:$0xff] %vm728_vm8, %v689_v45  ;;  %2034 = vrot.lane.b32.xlu0 %v1999_v28, %s3832_s23  ;;  %v4715_v45 = vld [vmem:[%s3872_s17 + $0x88] sm:$0xff]   ;;  %v3784_v28 = vld [vmem:[%s3872_s17 + $0x90] sm:$0xff]  }
  0xea   : > { %2036 = vrot.lane.b32.xlu1 %v2001_v52, %s3832_s23  ;;  %v1500_v52 = vor.u32 %v1499_v9, %v1496_v26  ;;  %v1764_v16 = vrot.slane %v4715_v45, 2  ;;  %v2617_v9 = vrot.slane %v3785_v40, 3 }
  0xeb   : > { %v928_v11 = vpop.permute.xlu0 %927  ;;  %v2702_v35 = vld [vmem:[#allocation2 + $0x20] sm:$0xff] }
  0xec   : > { %v930_v18 = vpop.permute.xlu1 %929  ;;  %976 = vst.msk [vmem:[#allocation2 + $0x30] sm:$0xff] %vm969_vm9, %v928_v11  ;;  %3555 = vmatprep.mubr.msk.bf16.mxu0 %vm2736_vm7, %v2702_v35  ;;  %v1510_v20 = vsel %vm1358_vm3, %v1500_v52, %v4711_v14  ;;  %v1501_v11 = vsel %vm1358_vm3, %v4590_v56, %v1500_v52  ;;  %v2354_v56 = vrot.slane %v2352_v41, 3 }
  0xed   : > { %977 = vst.msk [vmem:[#allocation2 + $0x38] sm:$0xff] %vm969_vm9, %v930_v18  ;;  %2408 = vrot.lane.b32.xlu0 %v2338_v29, %s3833_s24  ;;  %v2358_v18 = vshrl.u32 %v3784_v28, 16  ;;  %v2361_v29 = vshll.u32 %v3784_v28, 16 }
  0xee   : > { %2410 = vrot.lane.b32.xlu1 %v2347_v7, %s3833_s24  ;;  %v1762_v7 = vrot.slane %v3778_v49, 2  ;;  %v2355_v1 = vor.u32 %v2354_v56, %v2351_v39  ;;  %v3789_v49 = vld [vmem:[%s3872_s17 + $0x88] sm:$0xff]   ;;  %v1151_v56 = vrot.slane %v3791_v24, 1  ;;  %v3803_v24 = vld [vmem:[%s3872_s17 + $0x98] sm:$0xff]  }
  0xef   : > { %v1168_v44 = vpop.permute.xlu0 %1167  ;;  %v2703_v15 = vld [vmem:[#allocation2 + $0x28] sm:$0xff]  ;;  %v2360_v13 = vrot.slane %v2358_v18, 2  ;;  %v911_v41 = vrot.slane %v3789_v49, 1 }
  0xf0   : > { %v1170_v61 = vpop.permute.xlu1 %1169  ;;  %1216 = vst.msk [vmem:[#allocation2 + $0x30] sm:$0xff] %vm1209_vm10, %v1168_v44  ;;  %3556 = vmatmul.mubr.msk.bf16.gmra.mrb[8].mxu0 %vm2736_vm7, %v2703_v15  ;;  %v1765_v62 = vsel %vm1732_vm1, %v1762_v7, %v1764_v16  ;;  %v1763_v15 = vsel %vm1732_vm1, %v1760_v53, %v1762_v7 }
  0xf1   : > { %1217 = vst.msk [vmem:[#allocation2 + $0x38] sm:$0xff] %vm1209_vm10, %v1170_v61  ;;  %2649 = vrot.lane.b32.xlu0 %v2614_v47, %s3834_s25  ;;  %v2363_v61 = vrot.slane %v2361_v29, 3  ;;  %v3787_v47 = vld [vmem:[%s3872_s17 + $0x88] sm:$0xff]   ;;  %v3792_v29 = vld [vmem:[%s3872_s17 + $0x98] ss:$0 sps:$4 sm:$0x11]   ;;  %v912_v40 = vsel %vm877_vm0, %v909_v34, %v911_v41 }
  0xf2   : > { %702 = vrot.lane.b32.xlu1 %v649_v25, %s3830_s21  ;;  %v2004_v25 = vrot.slane %v4734_v30, 2  ;;  %v662_v53 = vshll.u32 %v3787_v47, 16  ;;  %v666_v6 = vshrl.u32 %v3787_v47, 16 }
  0xf3   : > { %v1542_v5 = vpop.permute.xlu0 %1541 }
  0xf4   : > { %v1544_v51 = vpop.permute.xlu1 %1543  ;;  %1590 = vst.msk [vmem:[#allocation2 + $0x30] sm:$0xff] %vm1583_vm11, %v1542_v5  ;;  %v2005_v60 = vsel %vm1732_vm1, %v2002_v38, %v2004_v25  ;;  %v3810_v5 = vld [vmem:[%s3872_s17 + $0x88] sm:$0xff]  }
  0xf5   : > { %1591 = vst.msk [vmem:[#allocation2 + $0x38] sm:$0xff] %vm1583_vm11, %v1544_v51  ;;  %2651 = vrot.lane.b32.xlu0 %v2616_v58, %s3834_s25  ;;  %v2003_v58 = vsel %vm1732_vm1, %v2000_v21, %v2002_v38  ;;  %v664_v21 = vrot.slane %v662_v53, 1  ;;  %v3797_v53 = vld [vmem:[%s3872_s17 + $0x98] ss:$0 sps:$4 sm:$0x33]  }
  0xf6   : > { %704 = vrot.lane.b32.xlu1 %v657_v3, %s3830_s21  ;;  %v4762_v3 = vor.u32 %v2363_v61, %v2360_v13  ;;  %394 = vst.msk [vmem:[#allocation2 + $0x88] sm:$0xff] %vm376_vm6, %v3810_v5  ;;  %v1153_v13 = vrot.slane %v3792_v29, 1  ;;  %v1152_v5 = vsel %vm877_vm0, %v1149_v4, %v1151_v56 }
  0xf7   : > { %v1783_v12 = vpop.permute.xlu0 %1782 }
  0xf8   : > { %v1785_v8 = vpop.permute.xlu1 %1784  ;;  %1831 = vst.msk [vmem:[#allocation2 + $0x30] sm:$0xff] %vm1824_vm12, %v1783_v12  ;;  %v2365_v54 = vsel %vm2213_vm4, %v2355_v1, %v4762_v3  ;;  %v1154_v17 = vsel %vm877_vm0, %v1151_v56, %v1153_v13 }
  0xf9   : > { %1832 = vst.msk [vmem:[#allocation2 + $0x38] sm:$0xff] %vm1824_vm12, %v1785_v8  ;;  %943 = vrot.lane.b32.xlu0 %v908_v10, %s3828_s19  ;;  %v2356_v8 = vsel %vm2213_vm4, %v4640_v36, %v2355_v1  ;;  %v658_v10 = vshrl.u32 %v4643_v22, 16  ;;  %v2620_v36 = vsel %vm2587_vm5, %v2617_v9, %v2619_v2  ;;  %v668_v22 = vor.u32 %v666_v6, %v664_v21  ;;  %v3796_v1 = vld [vmem:[%s3872_s17 + $0x90] sm:$0xff]   ;;  %v3800_v6 = vld [vmem:[%s3872_s17 + $0xa0] ss:$0 sps:$4 sm:$0x33]  }
  0xfa   : > { %945 = vrot.lane.b32.xlu1 %v910_v31, %s3828_s19  ;;  %v670_v31 = vshll.u32 %v3788_v57, 16  ;;  %v3801_v57 = vld [vmem:[%s3872_s17 + $0x98] sm:$0xff]  }
  0xfb   : > { %v2023_v33 = vpop.permute.xlu0 %2022 }
  0xfc   : > { %v2025_v0 = vpop.permute.xlu1 %2024  ;;  %2071 = vst.msk [vmem:[#allocation2 + $0x30] sm:$0xff] %vm2064_vm13, %v2023_v33  ;;  %v672_v28 = vrot.slane %v670_v31, 1  ;;  %v2618_v33 = vsel %vm2587_vm5, %v2615_v48, %v2617_v9  ;;  %v1766_v9 = vrot.slane %v3796_v1, 2  ;;  %v2367_v31 = vshrl.u32 %v3801_v57, 16 }
  0xfd   : > { %2072 = vst.msk [vmem:[#allocation2 + $0x38] sm:$0xff] %vm2064_vm13, %v2025_v0  ;;  %1183 = vrot.lane.b32.xlu0 %v1148_v19, %s3827_s18  ;;  %v3794_v0 = vld [vmem:[%s3872_s17 + $0x98] ss:$0 sps:$4 sm:$0x33]  }
  0xfe   : > { %1185 = vrot.lane.b32.xlu1 %v1150_v43, %s3827_s18  ;;  %v3790_v43 = vld [vmem:[%s3872_s17 + $0x90] ss:$0 sps:$4 sm:$0x11]   ;;  %v673_v55 = vsel %vm525_vm2, %v668_v22, %v672_v28  ;;  %v1521_v48 = vshrl.u32 %v3794_v0, 16 }
  0xff   : > { %v2397_v35 = vpop.permute.xlu0 %2396  ;;  %v913_v18 = vrot.slane %v3790_v43, 1 }
 0x100   : > { %v2399_v23 = vpop.permute.xlu1 %2398  ;;  %2445 = vst.msk [vmem:[#allocation2 + $0x30] sm:$0xff] %vm2438_vm14, %v2397_v35 }
 0x101   : > { %2446 = vst.msk [vmem:[#allocation2 + $0x38] sm:$0xff] %vm2438_vm14, %v2399_v23  ;;  %1557 = vrot.lane.b32.xlu0 %v1501_v11, %s3831_s22  ;;  %v1512_v23 = vshrl.u32 %v3793_v50, 16  ;;  %v1524_v11 = vshll.u32 %v3794_v0, 16  ;;  %v914_v39 = vsel %vm877_vm0, %v911_v41, %v913_v18  ;;  %v3804_v41 = vld [vmem:[%s3872_s17 + $0xa0] ss:$0 sps:$4 sm:$0x77]  }
 0x102   : > { %1559 = vrot.lane.b32.xlu1 %v1510_v20, %s3831_s22  ;;  %v660_v20 = vor.u32 %v658_v10, %v4672_v32  ;;  %v1515_v32 = vshll.u32 %v3793_v50, 16  ;;  %v2008_v50 = vrot.slane %v3800_v6, 2 }
 0x103   : > { %v2638_v46 = vpop.permute.xlu0 %2637  ;;  %v1514_v61 = vrot.slane %v1512_v23, 1  ;;  %v2621_v23 = vrot.slane %v3803_v24, 3 }
 0x104   : > { %v691_v44 = vpop.permute.xlu1 %690  ;;  %2686 = vst.msk [vmem:[#allocation2 + $0x30] sm:$0xff] %vm2679_vm15, %v2638_v46  ;;  %v1517_v47 = vrot.slane %v1515_v32, 2 }
 0x105   : > { %737 = vst.msk [vmem:[#allocation2 + $0x40] sm:$0xff] %vm728_vm8, %v691_v44  ;;  %1798 = vrot.lane.b32.xlu0 %v1763_v15, %s3829_s20  ;;  %v1523_v44 = vrot.slane %v1521_v48, 1  ;;  %v1526_v15 = vrot.slane %v1524_v11, 2 }
 0x106   : > { %1800 = vrot.lane.b32.xlu1 %v1765_v62, %s3829_s20  ;;  %v665_v62 = vsel %vm525_vm2, %v660_v20, %v664_v21  ;;  %v3799_v21 = vld [vmem:[%s3872_s17 + $0x98] sm:$0xff]  }
 0x107   : > { %v2640_v26 = vpop.permute.xlu0 %2639  ;;  %v1527_v42 = vor.u32 %v1526_v15, %v1523_v44  ;;  %v2006_v43 = vrot.slane %v3799_v21, 2 }
 0x108   : > { %v693_v51 = vpop.permute.xlu1 %692  ;;  %2687 = vst.msk [vmem:[#allocation2 + $0x38] sm:$0xff] %vm2679_vm15, %v2640_v26 }
 0x109   : > { %738 = vst.msk [vmem:[#allocation2 + $0x48] sm:$0xff] %vm728_vm8, %v693_v51  ;;  %2038 = vrot.lane.b32.xlu0 %v2003_v58, %s3832_s23  ;;  %v1518_v51 = vor.u32 %v1517_v47, %v1514_v61  ;;  %v3802_v58 = vld [vmem:[%s3872_s17 + $0xa0] ss:$0 sps:$4 sm:$0x77]   ;;  %v2009_v20 = vsel %vm1732_vm1, %v2006_v43, %v2008_v50  ;;  %v2007_v45 = vsel %vm1732_vm1, %v2004_v25, %v2006_v43 }
 0x10a   : > { %2040 = vrot.lane.b32.xlu1 %v2005_v60, %s3832_s23  ;;  %v2376_v63 = vshrl.u32 %v3802_v58, 16  ;;  %v2379_v10 = vshll.u32 %v3802_v58, 16 }
 0x10b   : > { %v932_v12 = vpop.permute.xlu0 %931  ;;  %v2704_v52 = vld [vmem:[#allocation2 + $0x30] sm:$0xff] }
 0x10c   : > { %v934_v37 = vpop.permute.xlu1 %933  ;;  %978 = vst.msk [vmem:[#allocation2 + $0x40] sm:$0xff] %vm969_vm9, %v932_v12  ;;  %3559 = vmatprep.mubr.msk.bf16.mxu0 %vm2736_vm7, %v2704_v52  ;;  %v1519_v12 = vsel %vm1358_vm3, %v4711_v14, %v1518_v51  ;;  %v2378_v28 = vrot.slane %v2376_v63, 2  ;;  %v2381_v0 = vrot.slane %v2379_v10, 3 }
 0x10d   : > { %979 = vst.msk [vmem:[#allocation2 + $0x48] sm:$0xff] %vm969_vm9, %v934_v37  ;;  %2412 = vrot.lane.b32.xlu0 %v2356_v8, %s3833_s24  ;;  %v1528_v37 = vsel %vm1358_vm3, %v1518_v51, %v1527_v42  ;;  %v2370_v8 = vshll.u32 %v3801_v57, 16 }
 0x10e   : > { %2414 = vrot.lane.b32.xlu1 %v2365_v54, %s3833_s24  ;;  %v1768_v54 = vrot.slane %v3797_v53, 2 }
 0x10f   : > { %v1172_v7 = vpop.permute.xlu0 %1171  ;;  %v2705_v27 = vld [vmem:[#allocation2 + $0x38] sm:$0xff]  ;;  %v2372_v22 = vrot.slane %v2370_v8, 3 }
 0x110   : > { %v1174_v19 = vpop.permute.xlu1 %1173  ;;  %1218 = vst.msk [vmem:[#allocation2 + $0x40] sm:$0xff] %vm1209_vm10, %v1172_v7  ;;  %3560 = vmatmul.mubr.msk.bf16.gmra.mrb[12].mxu0 %vm2736_vm7, %v2705_v27  ;;  %v1769_v49 = vsel %vm1732_vm1, %v1766_v9, %v1768_v54  ;;  %v2382_v27 = vor.u32 %v2381_v0, %v2378_v28 }
 0x111   : > { %1219 = vst.msk [vmem:[#allocation2 + $0x48] sm:$0xff] %vm1209_vm10, %v1174_v19  ;;  %2653 = vrot.lane.b32.xlu0 %v2618_v33, %s3834_s25  ;;  %v1767_v19 = vsel %vm1732_vm1, %v1764_v16, %v1766_v9 }
 0x112   : > { %2655 = vrot.lane.b32.xlu1 %v2620_v36, %s3834_s25  ;;  %v2369_v36 = vrot.slane %v2367_v31, 2 }
 0x113   : > { %v1546_v38 = vpop.permute.xlu0 %1545 }
 0x114   : > { %v1548_v35 = vpop.permute.xlu1 %1547  ;;  %1592 = vst.msk [vmem:[#allocation2 + $0x40] sm:$0xff] %vm1583_vm11, %v1546_v38  ;;  %v2373_v7 = vor.u32 %v2372_v22, %v2369_v36 }
 0x115   : > { %1593 = vst.msk [vmem:[#allocation2 + $0x48] sm:$0xff] %vm1583_vm11, %v1548_v35  ;;  %706 = vrot.lane.b32.xlu0 %v665_v62, %s3830_s21  ;;  %v2622_v62 = vsel %vm2587_vm5, %v2619_v2, %v2621_v23 }
 0x116   : > { %708 = vrot.lane.b32.xlu1 %v673_v55, %s3830_s21  ;;  %v2383_v29 = vsel %vm2213_vm4, %v2373_v7, %v2382_v27  ;;  %v2623_v55 = vrot.slane %v3804_v41, 3  ;;  %v2374_v48 = vsel %vm2213_vm4, %v4762_v3, %v2373_v7 }
 0x117   : > { %v1787_v60 = vpop.permute.xlu0 %1786 }
 0x118   : > { %v1789_v46 = vpop.permute.xlu1 %1788  ;;  %1833 = vst.msk [vmem:[#allocation2 + $0x40] sm:$0xff] %vm1824_vm12, %v1787_v60  ;;  %v2624_v11 = vsel %vm2587_vm5, %v2621_v23, %v2623_v55 }
 0x119   : > { %1834 = vst.msk [vmem:[#allocation2 + $0x48] sm:$0xff] %vm1824_vm12, %v1789_v46  ;;  %947 = vrot.lane.b32.xlu0 %v912_v40, %s3828_s19 }
 0x11a   : > { %949 = vrot.lane.b32.xlu1 %v914_v39, %s3828_s19 }
 0x11b   : > { %v2027_v26 = vpop.permute.xlu0 %2026 }
 0x11c   : > { %v2029_v34 = vpop.permute.xlu1 %2028  ;;  %2073 = vst.msk [vmem:[#allocation2 + $0x40] sm:$0xff] %vm2064_vm13, %v2027_v26 }
 0x11d   : > { %2074 = vst.msk [vmem:[#allocation2 + $0x48] sm:$0xff] %vm2064_vm13, %v2029_v34  ;;  %1187 = vrot.lane.b32.xlu0 %v1152_v5, %s3827_s18 }
 0x11e   : > { %1189 = vrot.lane.b32.xlu1 %v1154_v17, %s3827_s18 }
 0x11f   : > { %v2401_v52 = vpop.permute.xlu0 %2400 }
 0x120   : > { %v2403_v4 = vpop.permute.xlu1 %2402  ;;  %2447 = vst.msk [vmem:[#allocation2 + $0x40] sm:$0xff] %vm2438_vm14, %v2401_v52 }
 0x121   : > { %2448 = vst.msk [vmem:[#allocation2 + $0x48] sm:$0xff] %vm2438_vm14, %v2403_v4  ;;  %1561 = vrot.lane.b32.xlu0 %v1519_v12, %s3831_s22 }
 0x122   : > { %1563 = vrot.lane.b32.xlu1 %v1528_v37, %s3831_s22 }
 0x123   : > { %v2642_v33 = vpop.permute.xlu0 %2641 }
 0x124   : > { %v695_v14 = vpop.permute.xlu1 %694  ;;  %2688 = vst.msk [vmem:[#allocation2 + $0x40] sm:$0xff] %vm2679_vm15, %v2642_v33 }
 0x125   : > { %739 = vst.msk [vmem:[#allocation2 + $0x50] sm:$0xff] %vm728_vm8, %v695_v14  ;;  %1802 = vrot.lane.b32.xlu0 %v1767_v19, %s3829_s20 }
 0x126   : > { %1804 = vrot.lane.b32.xlu1 %v1769_v49, %s3829_s20 }
 0x127   : > { %v2644_v16 = vpop.permute.xlu0 %2643 }
 0x128   : > { %v697_v18 = vpop.permute.xlu1 %696  ;;  %2689 = vst.msk [vmem:[#allocation2 + $0x48] sm:$0xff] %vm2679_vm15, %v2644_v16 }
 0x129   : > { %740 = vst.msk [vmem:[#allocation2 + $0x58] sm:$0xff] %vm728_vm8, %v697_v18  ;;  %2042 = vrot.lane.b32.xlu0 %v2007_v45, %s3832_s23 }
 0x12a   : > { %2044 = vrot.lane.b32.xlu1 %v2009_v20, %s3832_s23  ;;  %s3279_s23 = sshll.u32 %s5038_s13, 3 }
 0x12b   : > { %v936_v30 = vpop.permute.xlu0 %935  ;;  %v2706_v25 = vld [vmem:[#allocation2 + $0x40] sm:$0xff]  ;;  %s168_s26 = scalar_lea.vmem %s5036_s3, %s3279_s23 }
 0x12c   : > { %v938_v32 = vpop.permute.xlu1 %937  ;;  %980 = vst.msk [vmem:[#allocation2 + $0x50] sm:$0xff] %vm969_vm9, %v936_v30  ;;  %3563 = vmatprep.mubr.msk.bf16.mxu0 %vm2736_vm7, %v2706_v25 }
 0x12d   : > { %981 = vst.msk [vmem:[#allocation2 + $0x58] sm:$0xff] %vm969_vm9, %v938_v32  ;;  %2416 = vrot.lane.b32.xlu0 %v2374_v48, %s3833_s24 }
 0x12e   : > { %2418 = vrot.lane.b32.xlu1 %v2383_v29, %s3833_s24 }
 0x12f   : > { %v1176_v3 = vpop.permute.xlu0 %1175  ;;  %v2707_v38 = vld [vmem:[#allocation2 + $0x48] sm:$0xff] }
 0x130   : > { %v1178_v35 = vpop.permute.xlu1 %1177  ;;  %1220 = vst.msk [vmem:[#allocation2 + $0x50] sm:$0xff] %vm1209_vm10, %v1176_v3  ;;  %3564 = vmatmul.mubr.msk.bf16.gmra.mrb[16].mxu0 %vm2736_vm7, %v2707_v38 }
 0x131   : > { %1221 = vst.msk [vmem:[#allocation2 + $0x58] sm:$0xff] %vm1209_vm10, %v1178_v35  ;;  %2657 = vrot.lane.b32.xlu0 %v2622_v62, %s3834_s25 }
 0x132   : > { %2659 = vrot.lane.b32.xlu1 %v2624_v11, %s3834_s25 }
 0x133   : > { %v1550_v56 = vpop.permute.xlu0 %1549 }
 0x134   : > { %v1552_v39 = vpop.permute.xlu1 %1551  ;;  %1594 = vst.msk [vmem:[#allocation2 + $0x50] sm:$0xff] %vm1583_vm11, %v1550_v56 }
 0x135   : > { %1595 = vst.msk [vmem:[#allocation2 + $0x58] sm:$0xff] %vm1583_vm11, %v1552_v39 }
 0x137   : > { %v1791_v2 = vpop.permute.xlu0 %1790 }
 0x138   : > { %v1793_v59 = vpop.permute.xlu1 %1792  ;;  %1835 = vst.msk [vmem:[#allocation2 + $0x50] sm:$0xff] %vm1824_vm12, %v1791_v2 }
 0x139   : > { %1836 = vst.msk [vmem:[#allocation2 + $0x58] sm:$0xff] %vm1824_vm12, %v1793_v59 }
 0x13b   : > { %v2031_v61 = vpop.permute.xlu0 %2030 }
 0x13c   : > { %v2033_v13 = vpop.permute.xlu1 %2032  ;;  %2075 = vst.msk [vmem:[#allocation2 + $0x50] sm:$0xff] %vm2064_vm13, %v2031_v61 }
 0x13d   : > { %2076 = vst.msk [vmem:[#allocation2 + $0x58] sm:$0xff] %vm2064_vm13, %v2033_v13 }
 0x13f   : > { %v2405_v44 = vpop.permute.xlu0 %2404 }
 0x140   : > { %v2407_v47 = vpop.permute.xlu1 %2406  ;;  %2449 = vst.msk [vmem:[#allocation2 + $0x50] sm:$0xff] %vm2438_vm14, %v2405_v44 }
 0x141   : > { %2450 = vst.msk [vmem:[#allocation2 + $0x58] sm:$0xff] %vm2438_vm14, %v2407_v47 }
 0x143   : > { %v2646_v46 = vpop.permute.xlu0 %2645 }
 0x144   : > { %v699_v15 = vpop.permute.xlu1 %698  ;;  %2690 = vst.msk [vmem:[#allocation2 + $0x50] sm:$0xff] %vm2679_vm15, %v2646_v46 }
 0x145   : > { %741 = vst.msk [vmem:[#allocation2 + $0x60] sm:$0xff] %vm728_vm8, %v699_v15 }
 0x147   : > { %v2648_v60 = vpop.permute.xlu0 %2647 }
 0x148   : > { %v701_v40 = vpop.permute.xlu1 %700  ;;  %2691 = vst.msk [vmem:[#allocation2 + $0x58] sm:$0xff] %vm2679_vm15, %v2648_v60 }
 0x149   : > { %742 = vst.msk [vmem:[#allocation2 + $0x68] sm:$0xff] %vm728_vm8, %v701_v40 }
 0x14b   : > { %v940_v53 = vpop.permute.xlu0 %939  ;;  %v2708_v57 = vld [vmem:[#allocation2 + $0x50] sm:$0xff] }
 0x14c   : > { %v942_v1 = vpop.permute.xlu1 %941  ;;  %982 = vst.msk [vmem:[#allocation2 + $0x60] sm:$0xff] %vm969_vm9, %v940_v53  ;;  %3567 = vmatprep.mubr.msk.bf16.mxu0 %vm2736_vm7, %v2708_v57 }
 0x14d   : > { %983 = vst.msk [vmem:[#allocation2 + $0x68] sm:$0xff] %vm969_vm9, %v942_v1 }
 0x14f   : > { %v1180_v51 = vpop.permute.xlu0 %1179  ;;  %v2709_v42 = vld [vmem:[#allocation2 + $0x58] sm:$0xff] }
 0x150   : > { %v1182_v17 = vpop.permute.xlu1 %1181  ;;  %1222 = vst.msk [vmem:[#allocation2 + $0x60] sm:$0xff] %vm1209_vm10, %v1180_v51  ;;  %3568 = vmatmul.mubr.msk.bf16.gmra.mrb[20].mxu0 %vm2736_vm7, %v2709_v42 }
 0x151   : > { %1223 = vst.msk [vmem:[#allocation2 + $0x68] sm:$0xff] %vm1209_vm10, %v1182_v17 }
 0x153   : > { %v1554_v34 = vpop.permute.xlu0 %1553 }
 0x154   : > { %v1556_v58 = vpop.permute.xlu1 %1555  ;;  %1596 = vst.msk [vmem:[#allocation2 + $0x60] sm:$0xff] %vm1583_vm11, %v1554_v34 }
 0x155   : > { %1597 = vst.msk [vmem:[#allocation2 + $0x68] sm:$0xff] %vm1583_vm11, %v1556_v58 }
 0x157   : > { %v1795_v26 = vpop.permute.xlu0 %1794 }
 0x158   : > { %v1797_v5 = vpop.permute.xlu1 %1796  ;;  %1837 = vst.msk [vmem:[#allocation2 + $0x60] sm:$0xff] %vm1824_vm12, %v1795_v26 }
 0x159   : > { %1838 = vst.msk [vmem:[#allocation2 + $0x68] sm:$0xff] %vm1824_vm12, %v1797_v5 }
 0x15b   : > { %v2035_v54 = vpop.permute.xlu0 %2034 }
 0x15c   : > { %v2037_v9 = vpop.permute.xlu1 %2036  ;;  %2077 = vst.msk [vmem:[#allocation2 + $0x60] sm:$0xff] %vm2064_vm13, %v2035_v54 }
 0x15d   : > { %2078 = vst.msk [vmem:[#allocation2 + $0x68] sm:$0xff] %vm2064_vm13, %v2037_v9 }
 0x15f   : > { %v2409_v6 = vpop.permute.xlu0 %2408 }
 0x160   : > { %v2411_v21 = vpop.permute.xlu1 %2410  ;;  %2451 = vst.msk [vmem:[#allocation2 + $0x60] sm:$0xff] %vm2438_vm14, %v2409_v6 }
 0x161   : > { %2452 = vst.msk [vmem:[#allocation2 + $0x68] sm:$0xff] %vm2438_vm14, %v2411_v21 }
 0x163   : > { %v2650_v37 = vpop.permute.xlu0 %2649 }
 0x164   : > { %v703_v31 = vpop.permute.xlu1 %702  ;;  %2692 = vst.msk [vmem:[#allocation2 + $0x60] sm:$0xff] %vm2679_vm15, %v2650_v37 }
 0x165   : > { %743 = vst.msk [vmem:[#allocation2 + $0x70] sm:$0xff] %vm728_vm8, %v703_v31 }
 0x167   : > { %v2652_v63 = vpop.permute.xlu0 %2651 }
 0x168   : > { %v705_v8 = vpop.permute.xlu1 %704  ;;  %2693 = vst.msk [vmem:[#allocation2 + $0x68] sm:$0xff] %vm2679_vm15, %v2652_v63 }
 0x169   : > { %744 = vst.msk [vmem:[#allocation2 + $0x78] sm:$0xff] %vm728_vm8, %v705_v8 }
 0x16b   : > { %v944_v4 = vpop.permute.xlu0 %943  ;;  %v2710_v12 = vld [vmem:[#allocation2 + $0x60] sm:$0xff] }
 0x16c   : > { %v946_v10 = vpop.permute.xlu1 %945  ;;  %984 = vst.msk [vmem:[#allocation2 + $0x70] sm:$0xff] %vm969_vm9, %v944_v4  ;;  %3571 = vmatprep.mubr.msk.bf16.mxu0 %vm2736_vm7, %v2710_v12 }
 0x16d   : > { %985 = vst.msk [vmem:[#allocation2 + $0x78] sm:$0xff] %vm969_vm9, %v946_v10 }
 0x16f   : > { %v1184_v49 = vpop.permute.xlu0 %1183  ;;  %v2711_v43 = vld [vmem:[#allocation2 + $0x68] sm:$0xff] }
 0x170   : > { %v1186_v52 = vpop.permute.xlu1 %1185  ;;  %1224 = vst.msk [vmem:[#allocation2 + $0x70] sm:$0xff] %vm1209_vm10, %v1184_v49  ;;  %3572 = vmatmul.mubr.msk.bf16.gmra.mrb[24].mxu0 %vm2736_vm7, %v2711_v43 }
 0x171   : > { %1225 = vst.msk [vmem:[#allocation2 + $0x78] sm:$0xff] %vm1209_vm10, %v1186_v52 }
 0x173   : > { %v1558_v36 = vpop.permute.xlu0 %1557 }
 0x174   : > { %v1560_v50 = vpop.permute.xlu1 %1559  ;;  %1598 = vst.msk [vmem:[#allocation2 + $0x70] sm:$0xff] %vm1583_vm11, %v1558_v36 }
 0x175   : > { %1599 = vst.msk [vmem:[#allocation2 + $0x78] sm:$0xff] %vm1583_vm11, %v1560_v50 }
 0x177   : > { %v1799_v28 = vpop.permute.xlu0 %1798 }
 0x178   : > { %v1801_v22 = vpop.permute.xlu1 %1800  ;;  %1839 = vst.msk [vmem:[#allocation2 + $0x70] sm:$0xff] %vm1824_vm12, %v1799_v28 }
 0x179   : > { %1840 = vst.msk [vmem:[#allocation2 + $0x78] sm:$0xff] %vm1824_vm12, %v1801_v22 }
 0x17b   : > { %v2039_v14 = vpop.permute.xlu0 %2038 }
 0x17c   : > { %v2041_v0 = vpop.permute.xlu1 %2040  ;;  %2079 = vst.msk [vmem:[#allocation2 + $0x70] sm:$0xff] %vm2064_vm13, %v2039_v14 }
 0x17d   : > { %2080 = vst.msk [vmem:[#allocation2 + $0x78] sm:$0xff] %vm2064_vm13, %v2041_v0 }
 0x17f   : > { %v2413_v33 = vpop.permute.xlu0 %2412 }
 0x180   : > { %v2415_v19 = vpop.permute.xlu1 %2414  ;;  %2453 = vst.msk [vmem:[#allocation2 + $0x70] sm:$0xff] %vm2438_vm14, %v2413_v33 }
 0x181   : > { %2454 = vst.msk [vmem:[#allocation2 + $0x78] sm:$0xff] %vm2438_vm14, %v2415_v19  ;;  %v170_v19 = vlaneseq }
 0x183   : > { %v2654_v7 = vpop.permute.xlu0 %2653  ;;  %v3549_v27 = vpop.f32.mrb[0].mxu0  ;;  %v4957_v33 = vand.u32 127, %v170_v19 }
 0x184   : > { %v2656_v20 = vpop.permute.xlu1 %2655  ;;  %2694 = vst.msk [vmem:[#allocation2 + $0x70] sm:$0xff] %vm2679_vm15, %v2654_v7  ;;  %v2829_v24 = vpop.f32.mrb[1].mxu0  ;;  %v2974_v18 = vmax.f32 %v3549_v27, 0.0 }
 0x185   : > { %2695 = vst.msk [vmem:[#allocation2 + $0x78] sm:$0xff] %vm2679_vm15, %v2656_v20  ;;  %v3550_v41 = vpop.f32.mrb[2].mxu0  ;;  %v2972_v23 = vmax.f32 %v2829_v24, 0.0  ;;  %v172_v20 = vadd.s32 128, %v4957_v33 }
 0x186   : > { %v2975_v45 = vmax.f32 %v3550_v41, 0.0  ;;  %v2832_v16 = vpop.f32.mrb[3].mxu0 }
 0x187   : > { %v2973_v55 = vmax.f32 %v2832_v16, 0.0  ;;  %v707_v32 = vpop.permute.xlu0 %706  ;;  %v4960_v7 = vmul.u32.u64.low 3817748708, %v172_v20  ;;  %v4961_v27 = vmul.u32.u64.high 3817748708, %v172_v20, %v4960_v7 }
 0x188   : > { %v709_v29 = vpop.permute.xlu1 %708  ;;  %v4922_v48 = vpack.c.bf16 %v2975_v45, %v2974_v18  ;;  %745 = vst.msk [vmem:[#allocation2 + $0x80] sm:$0xff] %vm728_vm8, %v707_v32 }
 0x189   : > { %746 = vst.msk [vmem:[#allocation2 + $0x88] sm:$0xff] %vm728_vm8, %v709_v29  ;;  %v4925_v30 = vpack.c.bf16 %v2973_v55, %v2972_v23  ;;  %v191_v24 = vshrl.u32 %v4961_v27, 4  ;;  %v3835_v23 = vmov 0.00390625|0.00390625  }
 0x18b   : > { %v948_v35 = vpop.permute.xlu0 %947  ;;  %v2712_v62 = vld [vmem:[#allocation2 + $0x70] sm:$0xff]  ;;  %v192_v41 = vmul.u32 18, %v191_v24 }
 0x18c   : > { %v950_v25 = vpop.permute.xlu1 %949  ;;  %v2713_v11 = vld [vmem:[#allocation2 + $0x78] sm:$0xff]  ;;  %986 = vst.msk [vmem:[#allocation2 + $0x80] sm:$0xff] %vm969_vm9, %v948_v35  ;;  %3575 = vmatprep.mubr.msk.bf16.mxu0 %vm2736_vm7, %v2712_v62 }
 0x18d   : > { %987 = vst.msk [vmem:[#allocation2 + $0x88] sm:$0xff] %vm969_vm9, %v950_v25  ;;  %3576 = vmatmul.mubr.msk.bf16.gmra.mrb[28].mxu0 %vm2736_vm7, %v2713_v11  ;;  %v193_v18 = vsub.s32 %v172_v20, %v192_v41 }
 0x18f   : > { %v1188_v38 = vpop.permute.xlu0 %1187  ;;  %vm208_vm0 = vcmp.ne.s32.totalorder %v193_v18, 0  ;;  %vm211_vm1 = vcmp.lt.s32.totalorder %v193_v18, 0  ;;  %v217_v45 = vadd.s32 18, %v193_v18 }
 0x190   : > { %v1190_v3 = vpop.permute.xlu1 %1189  ;;  %1226 = vst.msk [vmem:[#allocation2 + $0x80] sm:$0xff] %vm1209_vm10, %v1188_v38  ;;  %vm214_vm2 = vmand %vm211_vm1, %vm208_vm0  ;;  %v3836_v38 = vmov 0.0   ;;  %vm3112_vm0 = vcmp.eq.s32.totalorder %v4957_v33, 8 }
 0x191   : > { %1227 = vst.msk [vmem:[#allocation2 + $0x88] sm:$0xff] %vm1209_vm10, %v1190_v3  ;;  %v220_v16 = vsel %vm214_vm2, %v217_v45, %v193_v18  ;;  %231 = vst [vmem:[#allocation3] sm:$0xff] %v3836_v38 }
 0x192   : > { %vm223_vm3 = vcmp.lt.s32.totalorder %v220_v16, 16 }
 0x193   : > { %v1562_v56 = vpop.permute.xlu0 %1561  ;;  %vm3471_vm4 = vmpackc.low %vm223_vm3, %vm223_vm3 }
 0x194   : > { %v1564_v39 = vpop.permute.xlu1 %1563  ;;  %1600 = vst.msk [vmem:[#allocation2 + $0x80] sm:$0xff] %vm1583_vm11, %v1562_v56  ;;  %3472 = vmatprep.mubr.msk.bf16.mxu1 %vm3471_vm4, %v3835_v23 }
 0x195   : > { %1601 = vst.msk [vmem:[#allocation2 + $0x88] sm:$0xff] %vm1583_vm11, %v1564_v39  ;;  %vm3837_vm11 = vmmov 0  }
 0x197   : > { %v1803_v2 = vpop.permute.xlu0 %1802 }
 0x198   : > { %v1805_v59 = vpop.permute.xlu1 %1804  ;;  %1841 = vst.msk [vmem:[#allocation2 + $0x80] sm:$0xff] %vm1824_vm12, %v1803_v2 }
 0x199   : > { %1842 = vst.msk [vmem:[#allocation2 + $0x88] sm:$0xff] %vm1824_vm12, %v1805_v59 }
 0x19b   : > { %v2043_v61 = vpop.permute.xlu0 %2042 }
 0x19c   : > { %v2045_v13 = vpop.permute.xlu1 %2044  ;;  %2081 = vst.msk [vmem:[#allocation2 + $0x80] sm:$0xff] %vm2064_vm13, %v2043_v61 }
 0x19d   : > { %2082 = vst.msk [vmem:[#allocation2 + $0x88] sm:$0xff] %vm2064_vm13, %v2045_v13 }
 0x19f   : > { %v2417_v44 = vpop.permute.xlu0 %2416 }
 0x1a0   : > { %v2419_v47 = vpop.permute.xlu1 %2418  ;;  %2455 = vst.msk [vmem:[#allocation2 + $0x80] sm:$0xff] %vm2438_vm14, %v2417_v44 }
 0x1a1   : > { %2456 = vst.msk [vmem:[#allocation2 + $0x88] sm:$0xff] %vm2438_vm14, %v2419_v47 }
 0x1a3   : > { %v2658_v46 = vpop.permute.xlu0 %2657  ;;  %v3553_v40 = vpop.f32.mrb[4].mxu0 }
 0x1a4   : > { %v2660_v15 = vpop.permute.xlu1 %2659  ;;  %2696 = vst.msk [vmem:[#allocation2 + $0x80] sm:$0xff] %vm2679_vm15, %v2658_v46  ;;  %v2845_v60 = vpop.f32.mrb[5].mxu0  ;;  %v2978_v53 = vmax.f32 %v3553_v40, 0.0 }
 0x1a5   : > { %2697 = vst.msk [vmem:[#allocation2 + $0x88] sm:$0xff] %vm2679_vm15, %v2660_v15  ;;  %v3554_v1 = vpop.f32.mrb[6].mxu0  ;;  %v2976_v51 = vmax.f32 %v2845_v60, 0.0 }
 0x1a6   : > { %v2979_v57 = vmax.f32 %v3554_v1, 0.0  ;;  %v2848_v17 = vpop.f32.mrb[7].mxu0 }
 0x1a7   : > { %v2977_v42 = vmax.f32 %v2848_v17, 0.0 }
 0x1a8   : > { %v4943_v58 = vpack.c.bf16 %v2979_v57, %v2978_v53 }
 0x1a9   : > { %v4945_v34 = vpack.c.bf16 %v2977_v42, %v2976_v51 }
 0x1ab   : > { %v2714_v26 = vld [vmem:[#allocation2 + $0x80] sm:$0xff] }
 0x1ac   : > { %v2715_v5 = vld [vmem:[#allocation2 + $0x88] sm:$0xff]  ;;  %3579 = vmatprep.mubr.msk.bf16.mxu0 %vm2736_vm7, %v2714_v26 }
 0x1ad   : > { %3580 = vmatmul.mubr.msk.bf16.gmra.mrb[32].mxu0 %vm2736_vm7, %v2715_v5  ;;  %vm3026_vm7 = vcmask 261120  }
 0x1c3   : > { %v3557_v9 = vpop.f32.mrb[8].mxu0 }
 0x1c4   : > { %v2861_v54 = vpop.f32.mrb[9].mxu0  ;;  %v2982_v6 = vmax.f32 %v3557_v9, 0.0 }
 0x1c5   : > { %v3558_v21 = vpop.f32.mrb[10].mxu0  ;;  %v2980_v8 = vmax.f32 %v2861_v54, 0.0 }
 0x1c6   : > { %v2983_v31 = vmax.f32 %v3558_v21, 0.0  ;;  %v2864_v37 = vpop.f32.mrb[11].mxu0 }
 0x1c7   : > { %v2981_v63 = vmax.f32 %v2864_v37, 0.0 }
 0x1c8   : > { %v4949_v10 = vpack.c.bf16 %v2983_v31, %v2982_v6 }
 0x1c9   : > { %v4951_v4 = vpack.c.bf16 %v2981_v63, %v2980_v8 }
 0x1e3   : > { %v3561_v12 = vpop.f32.mrb[12].mxu0 }
 0x1e4   : > { %v2877_v52 = vpop.f32.mrb[13].mxu0  ;;  %v2986_v43 = vmax.f32 %v3561_v12, 0.0 }
 0x1e5   : > { %v3562_v49 = vpop.f32.mrb[14].mxu0  ;;  %v2984_v22 = vmax.f32 %v2877_v52, 0.0 }
 0x1e6   : > { %v2987_v50 = vmax.f32 %v3562_v49, 0.0  ;;  %v2880_v36 = vpop.f32.mrb[15].mxu0 }
 0x1e7   : > { %v2985_v28 = vmax.f32 %v2880_v36, 0.0 }
 0x1e8   : > { %v4953_v0 = vpack.c.bf16 %v2987_v50, %v2986_v43  ;;  %v173_v43 = vadd.s32 256, %v4957_v33 }
 0x1e9   : > { %v4955_v14 = vpack.c.bf16 %v2985_v28, %v2984_v22 }
 0x1ea   : > { %v4979_v22 = vmul.u32.u64.low 3817748708, %v173_v43  ;;  %v4980_v28 = vmul.u32.u64.high 3817748708, %v173_v43, %v4979_v22 }
 0x1ec   : > { %v202_v19 = vshrl.u32 %v4980_v28, 4 }
 0x1ee   : > { %v203_v20 = vmul.u32 18, %v202_v19 }
 0x1f0   : > { %v204_v7 = vsub.s32 %v173_v43, %v203_v20 }
 0x1f2   : > { %vm209_vm12 = vcmp.ne.s32.totalorder %v204_v7, 0  ;;  %vm212_vm13 = vcmp.lt.s32.totalorder %v204_v7, 0 }
 0x1f3   : > { %vm215_vm14 = vmand %vm212_vm13, %vm209_vm12 }
 0x203   : > { %v3565_v29 = vpop.f32.mrb[16].mxu0 }
 0x204   : > { %v2893_v55 = vpop.f32.mrb[17].mxu0  ;;  %v2990_v25 = vmax.f32 %v3565_v29, 0.0 }
 0x205   : > { %v3566_v32 = vpop.f32.mrb[18].mxu0  ;;  %v2988_v62 = vmax.f32 %v2893_v55, 0.0 }
 0x206   : > { %v2991_v11 = vmax.f32 %v3566_v32, 0.0  ;;  %v2896_v35 = vpop.f32.mrb[19].mxu0 }
 0x207   : > { %v2989_v3 = vmax.f32 %v2896_v35, 0.0  ;;  %v3811_v35 = vld [vmem:[%s5035_s2] sm:$0xff]  }
 0x208   : > { %v3017_v39 = vpack.c.bf16 %v2991_v11, %v2990_v25 }
 0x209   : > { %v3016_v56 = vpack.c.bf16 %v2989_v3, %v2988_v62  ;;  %v3812_v62 = vld [vmem:[%s5035_s2 + $0x8] sm:$0xff]   ;;  %v3813_v3 = vld [vmem:[%s5035_s2 + $0x10] sm:$0xff]  }
 0x20b   : > { %3507 = vmatprep.subr.bf16.mxu1 %v3016_v56  ;;  %v3815_v56 = vld [vmem:[%s5035_s2 + $0x20] sm:$0xff]  }
 0x20c   : > { %3508 = vmatpush3.bf16.msra.mxu1 %v4925_v30 }
 0x20d   : > { %3509 = vmatprep.subr.bf16.mxu1 %v3017_v39  ;;  %v3814_v39 = vld [vmem:[%s5035_s2 + $0x18] sm:$0xff]  }
 0x210   : > { %3510 = vmatpush3.bf16.msra.mxu1 %v4922_v48 }
 0x223   : > { %v3569_v59 = vpop.f32.mrb[20].mxu0 }
 0x224   : > { %v2909_v2 = vpop.f32.mrb[21].mxu0  ;;  %v2994_v61 = vmax.f32 %v3569_v59, 0.0  ;;  %v3816_v59 = vld [vmem:[%s5035_s2 + $0x28] sm:$0xff]  }
 0x225   : > { %v3570_v13 = vpop.f32.mrb[22].mxu0  ;;  %v2992_v15 = vmax.f32 %v2909_v2, 0.0  ;;  %v3817_v2 = vld [vmem:[%s5035_s2 + $0x30] sm:$0xff]  }
 0x226   : > { %v2995_v47 = vmax.f32 %v3570_v13, 0.0  ;;  %v2912_v44 = vpop.f32.mrb[23].mxu0  ;;  %v3818_v13 = vld [vmem:[%s5035_s2 + $0x38] sm:$0xff]  }
 0x227   : > { %v2993_v46 = vmax.f32 %v2912_v44, 0.0 }
 0x228   : > { %v3019_v40 = vpack.c.bf16 %v2995_v47, %v2994_v61 }
 0x229   : > { %v3018_v60 = vpack.c.bf16 %v2993_v46, %v2992_v15 }
 0x22b   : > { %3511 = vmatprep.subr.bf16.mxu1 %v3018_v60 }
 0x22c   : > { %3512 = vmatpush3.bf16.msra.mxu1 %v4945_v34  ;;  %v4972_v9 = vmul.u32.u64.low 3817748708, %v4957_v33  ;;  %v4973_v34 = vmul.u32.u64.high 3817748708, %v4957_v33, %v4972_v9 }
 0x22d   : > { %3513 = vmatprep.subr.bf16.mxu1 %v3019_v40 }
 0x230   : > { %3514 = vmatpush3.bf16.msra.mxu1 %v4943_v58  ;;  %v180_v58 = vshrl.u32 %v4973_v34, 4 }
 0x232   : > { %v181_v54 = vmul.u32 18, %v180_v58 }
 0x234   : > { %v182_v21 = vsub.s32 %v4957_v33, %v181_v54 }
 0x236   : > { %vm207_vm5 = vcmp.ne.s32.totalorder %v182_v21, 0  ;;  %vm210_vm6 = vcmp.lt.s32.totalorder %v182_v21, 0  ;;  %v216_v12 = vadd.s32 18, %v182_v21 }
 0x237   : > { %vm213_vm8 = vmand %vm210_vm6, %vm207_vm5 }
 0x238   : > { %v219_v36 = vsel %vm213_vm8, %v216_v12, %v182_v21 }
 0x239   : > { %vm222_vm9 = vcmp.lt.s32.totalorder %v219_v36, 16 }
 0x23a   : > { %vm3473_vm10 = vmpackc.low %vm222_vm9, %vm222_vm9 }
 0x243   : > { %v3573_v30 = vpop.f32.mrb[24].mxu0 }
 0x244   : > { %v2925_v1 = vpop.f32.mrb[25].mxu0  ;;  %v2998_v48 = vmax.f32 %v3573_v30, 0.0 }
 0x245   : > { %v3574_v53 = vpop.f32.mrb[26].mxu0  ;;  %v2996_v51 = vmax.f32 %v2925_v1, 0.0 }
 0x246   : > { %v2999_v57 = vmax.f32 %v3574_v53, 0.0  ;;  %v2928_v17 = vpop.f32.mrb[27].mxu0 }
 0x247   : > { %v2997_v42 = vmax.f32 %v2928_v17, 0.0 }
 0x248   : > { %v3021_v5 = vpack.c.bf16 %v2999_v57, %v2998_v48 }
 0x249   : > { %v3020_v26 = vpack.c.bf16 %v2997_v42, %v2996_v51 }
 0x24b   : > { %3515 = vmatprep.subr.bf16.mxu1 %v3020_v26 }
 0x24c   : > { %3516 = vmatpush3.bf16.msra.mxu1 %v4951_v4 }
 0x24d   : > { %3517 = vmatprep.subr.bf16.mxu1 %v3021_v5 }
 0x250   : > { %3518 = vmatpush3.bf16.msra.mxu1 %v4949_v10 }
 0x260   : > { %v3577_v6 = vpop.f32.mrb[28].mxu0 }
 0x261   : > { %v2941_v31 = vpop.f32.mrb[29].mxu0  ;;  %v3002_v8 = vmax.f32 %v3577_v6, 0.0 }
 0x262   : > { %v3578_v37 = vpop.f32.mrb[30].mxu0  ;;  %v3000_v52 = vmax.f32 %v2941_v31, 0.0 }
 0x263   : > { %v3003_v63 = vmax.f32 %v3578_v37, 0.0  ;;  %v2944_v4 = vpop.f32.mrb[31].mxu0 }
 0x264   : > { %v3001_v49 = vmax.f32 %v2944_v4, 0.0 }
 0x265   : > { %v3023_v10 = vpack.c.bf16 %v3003_v63, %v3002_v8 }
 0x266   : > { %v3022_v50 = vpack.c.bf16 %v3001_v49, %v3000_v52 }
 0x268   : > { %3519 = vmatprep.subr.bf16.mxu1 %v3022_v50 }
 0x269   : > { %3520 = vmatpush3.bf16.msra.mxu1 %v4955_v14  ;;  %v218_v14 = vadd.s32 18, %v204_v7 }
 0x26a   : > { %3521 = vmatprep.subr.bf16.mxu1 %v3023_v10 }
 0x26b   : > { %v221_v41 = vsel %vm215_vm14, %v218_v14, %v204_v7 }
 0x26c   : > { %vm224_vm15 = vcmp.lt.s32.totalorder %v221_v41, 16 }
 0x26d   : > { %3522 = vmatpush3.bf16.msra.mxu1 %v4953_v0  ;;  %v227_v25 = vsel %vm224_vm15, 0.00390625, %v3836_v38 }
 0x26e   : > { %3583 = vmatprep.subr.bf16.mxu1 %v3836_v38  ;;  %v230_v11 = vpack.c.bf16 %v227_v25, %v227_v25 }
 0x270   : > { %3474 = vmatmul.mubr.msk.bf16.vlgmr.msra.gmra.mrb[0].mxu1 %vm3473_vm10, %v3835_v23 }
 0x271   : > { %3587 = vmatprep.mubr.msk.bf16.mxu1 %vm3837_vm11, %v3836_v38 }
 0x280   : > { %v3581_v27 = vpop.f32.mrb[32].mxu0 }
 0x281   : > { %v2957_v24 = vpop.f32.mrb[33].mxu0  ;;  %v3006_v18 = vmax.f32 %v3581_v27, 0.0 }
 0x282   : > { %v3582_v0 = vpop.f32.mrb[34].mxu0  ;;  %v3004_v29 = vmax.f32 %v2957_v24, 0.0 }
 0x283   : > { %v3007_v45 = vmax.f32 %v3582_v0, 0.0  ;;  %v2960_v16 = vpop.f32.mrb[35].mxu0 }
 0x284   : > { %v3005_v23 = vmax.f32 %v2960_v16, 0.0 }
 0x285   : > { %v3025_v55 = vpack.c.bf16 %v3007_v45, %v3006_v18 }
 0x286   : > { %v3024_v32 = vpack.c.bf16 %v3005_v23, %v3004_v29 }
 0x288   : > { %3584 = vmatpush3.bf16.msra.mxu1 %v3024_v32 }
 0x289   : > { %3585 = vmatprep.subr.bf16.mxu1 %v3836_v38 }
 0x28c   : > { %3586 = vmatpush3.bf16.msra.mxu1 %v3025_v55 }
 0x28d   : > { %3591 = vmatprep.subr.bf16.mxu1 %v3836_v38 }
 0x28f   : > { %3588 = vmatmul.mubr.msk.bf16.vlgmr.msra.gmra.mrb[4].mxu1 %vm3026_vm7, %v230_v11 }
 0x290   : > { %3592 = vmatpush3.bf16.msra.mxu1 %v3811_v35  ;;  %3607 = vmatprep.mubr.msk.bf16.mxu1 %vm3837_vm11, %v3836_v38 }
 0x291   : > { %3593 = vmatprep.subr.bf16.mxu1 %v3836_v38 }
 0x294   : > { %3594 = vmatpush3.bf16.msra.mxu1 %v3812_v62 }
 0x295   : > { %3595 = vmatprep.subr.bf16.mxu1 %v3836_v38 }
 0x298   : > { %3596 = vmatpush3.bf16.msra.mxu1 %v3813_v3 }
 0x299   : > { %3597 = vmatprep.subr.bf16.mxu1 %v3836_v38 }
 0x29c   : > { %3598 = vmatpush3.bf16.msra.mxu1 %v3814_v39 }
 0x29d   : > { %3599 = vmatprep.subr.bf16.mxu1 %v3836_v38 }
 0x2a0   : > { %3600 = vmatpush3.bf16.msra.mxu1 %v3815_v56 }
 0x2a1   : > { %3601 = vmatprep.subr.bf16.mxu1 %v3836_v38 }
 0x2a4   : > { %3602 = vmatpush3.bf16.msra.mxu1 %v3816_v59 }
 0x2a5   : > { %3603 = vmatprep.subr.bf16.mxu1 %v3836_v38 }
 0x2a8   : > { %3604 = vmatpush3.bf16.msra.mxu1 %v3817_v2 }
 0x2a9   : > { %3605 = vmatprep.subr.bf16.mxu1 %v3836_v38 }
 0x2ac   : > { %3606 = vmatpush3.bf16.msra.mxu1 %v3818_v13 }
 0x343   : > { %v3523_v61 = vpop.f32.mrb[0].mxu1 }
 0x344   : > { %v3524_v47 = vpop.f32.mrb[1].mxu1 }
 0x345   : > { %v3525_v44 = vadd.f32 %v3524_v47, %v3523_v61  ;;  %v3526_v15 = vpop.f32.mrb[2].mxu1 }
 0x346   : > { %v3527_v46 = vpop.f32.mrb[3].mxu1 }
 0x362   : > { %v3104_v40 = vpop.f32.mrb[4].mxu1 }
 0x363   : > { %v3105_v60 = vadd.f32 %v3525_v44, %v3104_v40  ;;  %v3589_v30 = vpop.f32.mrb[5].mxu1 }
 0x364   : > { %v3107_v1 = vpop.f32.mrb[6].mxu1 }
 0x365   : > { %3110 = vst [vmem:[#allocation3] sm:$0x1] %v3105_v60  ;;  %v3590_v53 = vpop.f32.mrb[7].mxu1 }
 0x36c   : > { %v3111_v48 = vld [vmem:[#allocation3] sm:$0xff] }
 0x36d   : > { %v3113_v57 = vsel %vm3112_vm0, 1.0, %v3111_v48 }
 0x36e   : > { %v3114_v17 = vpack.c.bf16 %v3113_v57, %v3113_v57 }
 0x370   : > { %3608 = vmatmul.mubr.bf16.vlgmr.msra.gmra.mrb[8].mxu1 %v3114_v17 }
 0x443   : > { %v3213_v38 = vpop.f32.mrb[8].mxu1 }
 0x444   : > { %3219 = vst [vmem:[%s168_s26] sm:$0xff] %v3213_v38  ;;  %v3609_v51 = vpop.f32.mrb[9].mxu1 }
 0x445   : > { %v3216_v42 = vpop.f32.mrb[10].mxu1 }
 0x446   : > { %v3610_v5 = vpop.f32.mrb[11].mxu1 }
 0x447 PF: > { %s13_s12 = sadd.s32 1, %s3825_s12  }
 0x448   : > { %p10_p4 = scmp.ge.s32.totalorder %s13_s12, 4  }
 0x44a   :  { %12 = sbr.rel (!%p10_p4) target bundleno = 1 (0x1), region = 62 }

</bundles_post_ra>
